<compile_context>
chip_gen: v7x
topology: tpu7x:2x2x1
jax: 0.10.0
libtpu: 0.0.40
codegen_flags: <defaults>
</compile_context>

<pallas_src>
import functools

import jax
import jax.numpy as jnp
from jax import lax
from jax.experimental import pallas as pl
from jax.experimental.pallas import tpu as pltpu


_LANES = 128
_SUBLANES = 8


def _round_up(x, m):
    return (x + m - 1) // m * m


def _vmem_capacity_bytes():
    """Physical VMEM of the local chip; conservative fallback = v7x per-core."""
    try:
        info = pltpu.get_tpu_info()
        cap = getattr(info, "vmem_capacity_bytes", None)
        if cap:
            return int(cap)
    except Exception:
        pass
    return 64 * 1024 * 1024


def _vmem_budgets():
    """(vmem_limit_bytes for CompilerParams, per-grid-step working-set budget)."""
    cap = _vmem_capacity_bytes()
    # ~45% headroom for Mosaic-internal scratch, relayout copies, semaphores.
    limit = min(max(int(cap * 0.55), 32 * 1024 * 1024), 100 * 1024 * 1024)
    budget = int(limit * 0.75)
    return limit, budget


def _conv_step_footprint(TH, W, Wp, K, Cin, Cout, Cp, in_itemsize, fuse_taps):
    """Approx VMEM bytes for one conv grid step, *including* (8,128) tile
    padding and the double buffer the auto-pipeliner adds to every BlockSpec."""
    sub = lambda v: _round_up(max(int(v), 1), _SUBLANES)
    lane = lambda v: _round_up(max(int(v), 1), _LANES)
    TQ = TH * W
    Kc = K * K * Cin
    fp = 0
    # Input stripe block (TH+K-1, Wp, Cin): Cin sits on lanes -> padded to 128.
    fp += 2 * (TH + K - 1) * sub(Wp) * lane(Cin) * in_itemsize
    # Weight block (constant index_map, still double-buffered by default).
    if fuse_taps:
        fp += 2 * sub(Cp) * lane(Kc) * in_itemsize
    else:
        fp += 2 * K * K * sub(Cin) * lane(Cp) * in_itemsize
    # Conv output block (Cout, TQ) f32 + the two (Cp, 1) stat blocks.
    fp += 2 * sub(Cout) * lane(TQ) * 4
    fp += 2 * 2 * sub(Cp) * lane(1) * 4
    # In-kernel temporaries: transposed patch (Kc, TQ), f32 accumulator
    # (Cp, TQ) and slack for tap relayout copies.
    if fuse_taps:
        fp += 2 * sub(Kc) * lane(TQ) * in_itemsize
    fp += 2 * sub(Cp) * lane(TQ) * 4
    return fp


def _pick_row_tile(N, H, W, K, Cin, Cout, Cp, in_itemsize, fuse_taps, budget):
    """Largest row tile TH dividing H whose padded per-step footprint fits the
    budget and keeps the (Cout, TH*W) output store lane-dense."""
    Wp = W + (K - 1)
    candidates = sorted(
        (th for th in range(1, H + 1)
         if H % th == 0 and (th == H or (th * W) % _LANES == 0)),
        reverse=True)
    fitting = [th for th in candidates
               if _conv_step_footprint(th, W, Wp, K, Cin, Cout, Cp,
                                       in_itemsize, fuse_taps) <= budget]
    # TODO(synk): add a reduction grid axis if even the smallest lane-friendly
    # row tile overflows the per-step budget.
    pool = fitting if fitting else [candidates[-1]]
    # v7x has 2 TensorCores: with batch 1, make sure the row axis feeds both.
    min_tiles = 2 if N == 1 else 1
    multi = [th for th in pool if H // th >= min_tiles]
    return (multi or pool)[0]


def _pick_bn_tile(HW, Cout, budget):
    """Largest lane-dense column slab for the HBM-bound BN-affine pass."""
    for t in range(1, HW + 1):
        if HW % t:
            continue
        tq = HW // t
        if tq != HW and tq % _LANES:
            continue
        fp = 4 * _round_up(Cout, _SUBLANES) * _round_up(tq, _LANES) * 4
        if fp <= budget:
            return tq
    return HW


def _conv_stats_fused_kernel(x_ref, w_ref, y_ref, sum_ref, sq_ref, *,
                             K, TH, W, Cout, Cin, precision):
    """Small-Cin conv: all K*K taps fused into ONE MXU matmul.

    x_ref  : (TH+K-1, Wp, Cin)  halo row stripe (MXU dtype)
    w_ref  : (Cp, K*K*Cin)      weights, Cout sublane-padded to Cp
    y_ref  : (Cout, TH*W)       conv output, channels-major (NCHW-ready)
    sum_ref: (Cp, 1)            per-tile BN partial sums
    sq_ref : (Cp, 1)            per-tile BN partial sums of squares
    """
    TQ = TH * W
    taps = []
    for kh in range(K):
        for kw in range(K):
            # (TH, W, Cin) window -> (TQ, Cin) -> (Cin, TQ); stacking the taps
            # along sublanes builds the (K*K*Cin, TQ) patch without any
            # lane-offset stores.
            taps.append(x_ref[kh:kh + TH, kw:kw + W, :].reshape(TQ, Cin).T)
    patch_t = jnp.concatenate(taps, axis=0)                     # (K*K*Cin, TQ)

    # Single matmul, contraction = K*K*Cin; result is already channels-major,
    # so no XLU result transpose is needed before the store.
    acc_t = jnp.dot(w_ref[...], patch_t,
                    preferred_element_type=jnp.float32, precision=precision)

    y_ref[...] = acc_t[:Cout, :].astype(y_ref.dtype)
    # Per-tile BN partials (padded Cout rows are zero -> harmless).
    sum_ref[...] = jnp.sum(acc_t, axis=1, keepdims=True)
    sq_ref[...] = jnp.sum(acc_t * acc_t, axis=1, keepdims=True)


def _conv_stats_taps_kernel(x_ref, w_ref, y_ref, sum_ref, sq_ref, *,
                            K, TH, W, Cout, Cin, Cp, precision):
    """Large-Cin conv: per-tap matmuls (contraction = Cin already keeps the MXU
    busy; fusing the taps would blow up the in-VMEM patch)."""
    TQ = TH * W
    acc = jnp.zeros((TQ, Cp), jnp.float32)
    for kh in range(K):
        for kw in range(K):
            patch = x_ref[kh:kh + TH, kw:kw + W, :].reshape(TQ, Cin)
            acc += jnp.dot(patch, w_ref[kh, kw],
                           preferred_element_type=jnp.float32,
                           precision=precision)
    acc_t = acc.T
    y_ref[...] = acc_t[:Cout, :].astype(y_ref.dtype)
    sum_ref[...] = jnp.sum(acc_t, axis=1, keepdims=True)
    sq_ref[...] = jnp.sum(acc_t * acc_t, axis=1, keepdims=True)


def _bn_apply_kernel(y_ref, scale_ref, shift_ref, o_ref):
    """Elementwise y * scale + shift on the channels-major layout.

    y_ref/o_ref: (Cout, TQ2); scale/shift: (Cout, 1) broadcast along lanes.
    """
    o_ref[...] = y_ref[...] * scale_ref[...] + shift_ref[...]


def cb_forward(x_nchw, w_oihw, gamma, beta, *, eps=1e-3, row_tile=None,
               mxu_dtype=jnp.float32, precision=None):
    """Forward pass of CB(nIn, nOut, kSize, stride=1).

    x_nchw : (N, Cin, H, W)    float32
    w_oihw : (Cout, Cin, K, K) float32 (PyTorch Conv2d weight layout)
    gamma, beta : (Cout,)      BatchNorm affine parameters

    mxu_dtype=jnp.bfloat16 halves input/weight DMA and unlocks the bf16-native
    MXU on v6e/v7x when the accuracy budget allows (kept f32 here for 1e-4
    tolerance).  precision=lax.Precision.HIGHEST forces full-f32 matmul passes
    for strict accuracy at larger scales.
    """
    N, Cin, H, W = x_nchw.shape
    Cout, Cin_w, K, K2 = w_oihw.shape
    assert Cin_w == Cin and K == K2
    assert K % 2 == 1, "only odd kernel sizes supported"  # TODO(synk): even kSize
    # TODO(synk): stride > 1 is not implemented (module default stride=1).
    pad = (K - 1) // 2
    Wp = W + 2 * pad
    Cp = _round_up(Cout, _LANES)
    HW = H * W
    Kc = K * K * Cin
    f32 = jnp.float32
    in_itemsize = jnp.dtype(mxu_dtype).itemsize

    vmem_limit, budget = _vmem_budgets()
    fuse_taps = Cin < 64

    TH = row_tile if row_tile is not None else _pick_row_tile(
        N, H, W, K, Cin, Cout, Cp, in_itemsize, fuse_taps, budget)
    assert H % TH == 0 and (TH == H or (TH * W) % _LANES == 0), (H, W, TH)
    T = H // TH
    TQ = TH * W

    # ---- wrapper glue: NCHW -> NHWC + zero-pad (one fused XLA pass) ----------
    x = jnp.transpose(x_nchw, (0, 2, 3, 1)).astype(mxu_dtype)
    x_pad = jnp.pad(x, ((0, 0), (pad, pad), (pad, pad), (0, 0)))
    if T == 1:
        x_tiles = x_pad[:, None]        # no halo duplication, no extra copy
    else:
        x_tiles = jnp.stack(
            [x_pad[:, t * TH:t * TH + TH + K - 1] for t in range(T)], axis=1)

    # Weights: OIHW -> (K, K, Cin, Cout), lane-pad Cout to Cp; the fused path
    # collapses the taps so the kernel does ONE (Cp,K*K*Cin)@(K*K*Cin,TQ).
    w = jnp.transpose(w_oihw, (2, 3, 1, 0)).astype(mxu_dtype)
    w = jnp.pad(w, ((0, 0), (0, 0), (0, 0), (0, Cp - Cout)))
    if fuse_taps:
        w = w.reshape(Kc, Cp).T                                   # (Cp, Kc)
        w_spec = pl.BlockSpec((Cp, Kc), lambda n, t: (0, 0))
        conv_kernel = functools.partial(
            _conv_stats_fused_kernel, K=K, TH=TH, W=W, Cout=Cout, Cin=Cin,
            precision=precision)
    else:
        w_spec = pl.BlockSpec((K, K, Cin, Cp), lambda n, t: (0, 0, 0, 0))
        conv_kernel = functools.partial(
            _conv_stats_taps_kernel, K=K, TH=TH, W=W, Cout=Cout, Cin=Cin,
            Cp=Cp, precision=precision)

    # ---- Pallas kernel 1: conv (fused-tap matmul) + per-tile BN partials -----
    y, sum_p, sq_p = pl.pallas_call(
        conv_kernel,
        out_shape=(
            jax.ShapeDtypeStruct((N, Cout, HW), f32),   # channels-major conv out
            jax.ShapeDtypeStruct((N, T, Cp, 1), f32),   # per-(image, tile) sums
            jax.ShapeDtypeStruct((N, T, Cp, 1), f32),   # per-(image, tile) sumsq
        ),
        grid_spec=pltpu.PrefetchScalarGridSpec(
            num_scalar_prefetch=0,
            grid=(N, T),
            in_specs=[
                pl.BlockSpec((pl.Squeezed(), pl.Squeezed(), TH + K - 1, Wp, Cin),
                             lambda n, t: (n, t, 0, 0, 0)),
                w_spec,
            ],
            out_specs=(
                pl.BlockSpec((pl.Squeezed(), Cout, TQ), lambda n, t: (n, 0, t)),
                pl.BlockSpec((pl.Squeezed(), pl.Squeezed(), Cp, 1),
                             lambda n, t: (n, t, 0, 0)),
                pl.BlockSpec((pl.Squeezed(), pl.Squeezed(), Cp, 1),
                             lambda n, t: (n, t, 0, 0)),
            ),
        ),
        compiler_params=pltpu.CompilerParams(
            dimension_semantics=("parallel", "parallel"),
            vmem_limit_bytes=vmem_limit),
    )(x_tiles, w)

    # ---- BN statistics: Chan (parallel-Welford) combine of tile partials -----
    s = sum_p[:, :, :Cout, 0]                # (N, T, Cout)
    q = sq_p[:, :, :Cout, 0]                 # (N, T, Cout)
    n_t = jnp.float32(TQ)
    cnt = jnp.float32(N * HW)
    mean_t = s / n_t
    m2_t = q - s * mean_t                    # per-tile centered sum of squares
    mean = jnp.sum(s, axis=(0, 1)) / cnt
    m2 = (jnp.sum(m2_t, axis=(0, 1))
          + n_t * jnp.sum((mean_t - mean) ** 2, axis=(0, 1)))
    var = m2 / cnt                           # biased variance (training BN)
    inv_std = lax.rsqrt(var + jnp.float32(eps))
    g = gamma.astype(f32)
    scale = (g * inv_std).reshape(Cout, 1)
    shift = (beta.astype(f32) - mean * g * inv_std).reshape(Cout, 1)

    # ---- Pallas kernel 2: BN affine apply on big lane-dense slabs ------------
    TQ2 = _pick_bn_tile(HW, Cout, budget)
    T2 = HW // TQ2
    out = pl.pallas_call(
        _bn_apply_kernel,
        out_shape=jax.ShapeDtypeStruct((N, Cout, HW), f32),
        grid_spec=pltpu.PrefetchScalarGridSpec(
            num_scalar_prefetch=0,
            grid=(N, T2),
            in_specs=[
                pl.BlockSpec((pl.Squeezed(), Cout, TQ2), lambda n, t: (n, 0, t)),
                pl.BlockSpec((Cout, 1), lambda n, t: (0, 0)),
                pl.BlockSpec((Cout, 1), lambda n, t: (0, 0)),
            ],
            out_specs=pl.BlockSpec((pl.Squeezed(), Cout, TQ2),
                                   lambda n, t: (n, 0, t)),
        ),
        input_output_aliases={0: 0},  # reuse y's HBM buffer for the BN output
        compiler_params=pltpu.CompilerParams(
            dimension_semantics=("parallel", "parallel"),
            vmem_limit_bytes=vmem_limit),
    )(y, scale, shift)

    # Already channels-major: the NCHW reshape is free (no data movement).
    return out.reshape(N, Cout, H, W)


def _reference(x_nchw, w_oihw, gamma, beta, eps=1e-3):
    """Pure-JAX reference matching PyTorch CB.forward (training-mode BN)."""
    pad = (w_oihw.shape[-1] - 1) // 2
    y = lax.conv_general_dilated(
        x_nchw, w_oihw, window_strides=(1, 1),
        padding=((pad, pad), (pad, pad)),
        dimension_numbers=("NCHW", "OIHW", "NCHW"))
    mean = jnp.mean(y, axis=(0, 2, 3))
    var = jnp.mean((y - mean[None, :, None, None]) ** 2, axis=(0, 2, 3))
    inv = lax.rsqrt(var + eps)
    return ((y - mean[None, :, None, None]) * inv[None, :, None, None]
            * gamma[None, :, None, None] + beta[None, :, None, None])


if __name__ == "__main__":
    # Small shapes consistent with the module: N=2, nIn=4, nOut=8, 16x16, k=3.
    N, Cin, Cout, H, W, K = 2, 4, 8, 16, 16, 3
    key = jax.random.PRNGKey(0)
    kx, kw_key, kg, kb = jax.random.split(key, 4)

    x = jax.random.normal(kx, (N, Cin, H, W), dtype=jnp.float32)
    w = jax.random.normal(kw_key, (Cout, Cin, K, K), dtype=jnp.float32) * 0.1
    gamma = 1.0 + 0.1 * jax.random.normal(kg, (Cout,), dtype=jnp.float32)
    beta = 0.1 * jax.random.normal(kb, (Cout,), dtype=jnp.float32)

    ref = _reference(x, w, gamma, beta, eps=1e-3)

    # Auto-tiled path (chip-derived VMEM budget; whole image per step here).
    fwd_auto = jax.jit(functools.partial(cb_forward, eps=1e-3))
    out_auto = jax.block_until_ready(fwd_auto(x, w, gamma, beta))
    assert out_auto.shape == (N, Cout, H, W), out_auto.shape
    err_auto = float(jnp.max(jnp.abs(out_auto - ref)))
    assert jnp.allclose(out_auto, ref, atol=1e-4, rtol=1e-4), err_auto

    # Forced multi-tile path (grid=(N, 2)) to exercise the halo-stripe pipeline.
    fwd_tiled = jax.jit(functools.partial(cb_forward, eps=1e-3, row_tile=8))
    out_tiled = jax.block_until_ready(fwd_tiled(x, w, gamma, beta))
    err_tiled = float(jnp.max(jnp.abs(out_tiled - ref)))
    assert jnp.allclose(out_tiled, ref, atol=1e-4, rtol=1e-4), err_tiled

    print("KERNEL_OK")
</pallas_src>

<mosaic_0001>
module attributes {stable_mosaic.version = 11 : i64} {
  func.func @_conv_stats_fused_kernel(%arg0: i32, %arg1: i32, %arg2: memref<1x1x18x18x4xf32, #tpu.memory_space<vmem>>, %arg3: memref<128x36xf32, #tpu.memory_space<vmem>>, %arg4: memref<1x8x256xf32, #tpu.memory_space<vmem>>, %arg5: memref<1x1x128x1xf32, #tpu.memory_space<vmem>>, %arg6: memref<1x1x128x1xf32, #tpu.memory_space<vmem>>) attributes {dimension_semantics = [#tpu.dimension_semantics<parallel>, #tpu.dimension_semantics<parallel>], iteration_bounds = array<i64: 2, 1>, scalar_prefetch = 0 : i64, scratch_operands = 0 : i64, tpu.core_type = #tpu.core_type<tc>, window_params = [{transform_indices = @transform_0, window_bounds = array<i64: 1, 1, 18, 18, 4>}, {pipeline_mode = #tpu.pipeline_mode<synchronous>, transform_indices = @transform_1, window_bounds = array<i64: 128, 36>}, {transform_indices = @transform_2, window_bounds = array<i64: 1, 8, 256>}, {transform_indices = @transform_3, window_bounds = array<i64: 1, 1, 128, 1>}, {transform_indices = @transform_4, window_bounds = array<i64: 1, 1, 128, 1>}]} {
    %c0 = arith.constant 0 : index
    %c0_0 = arith.constant 0 : index
    %c0_1 = arith.constant 0 : index
    %c0_2 = arith.constant 0 : index
    %c0_3 = arith.constant 0 : index
    %0 = vector.load %arg2[%c0, %c0_0, %c0_1, %c0_2, %c0_3] : memref<1x1x18x18x4xf32, #tpu.memory_space<vmem>>, vector<1x1x16x16x4xf32>
    %1 = vector.shape_cast %0 : vector<1x1x16x16x4xf32> to vector<16x16x4xf32>
    %2 = vector.shape_cast %1 : vector<16x16x4xf32> to vector<256x4xf32>
    %3 = tpu.transpose %2, [1, 0] : vector<256x4xf32> -> vector<4x256xf32>
    %c0_4 = arith.constant 0 : index
    %c0_5 = arith.constant 0 : index
    %c0_6 = arith.constant 0 : index
    %c1 = arith.constant 1 : index
    %c0_7 = arith.constant 0 : index
    %4 = vector.load %arg2[%c0_4, %c0_5, %c0_6, %c1, %c0_7] : memref<1x1x18x18x4xf32, #tpu.memory_space<vmem>>, vector<1x1x16x16x4xf32>
    %5 = vector.shape_cast %4 : vector<1x1x16x16x4xf32> to vector<16x16x4xf32>
    %6 = vector.shape_cast %5 : vector<16x16x4xf32> to vector<256x4xf32>
    %7 = tpu.transpose %6, [1, 0] : vector<256x4xf32> -> vector<4x256xf32>
    %c0_8 = arith.constant 0 : index
    %c0_9 = arith.constant 0 : index
    %c0_10 = arith.constant 0 : index
    %c2 = arith.constant 2 : index
    %c0_11 = arith.constant 0 : index
    %8 = vector.load %arg2[%c0_8, %c0_9, %c0_10, %c2, %c0_11] : memref<1x1x18x18x4xf32, #tpu.memory_space<vmem>>, vector<1x1x16x16x4xf32>
    %9 = vector.shape_cast %8 : vector<1x1x16x16x4xf32> to vector<16x16x4xf32>
    %10 = vector.shape_cast %9 : vector<16x16x4xf32> to vector<256x4xf32>
    %11 = tpu.transpose %10, [1, 0] : vector<256x4xf32> -> vector<4x256xf32>
    %c0_12 = arith.constant 0 : index
    %c0_13 = arith.constant 0 : index
    %c1_14 = arith.constant 1 : index
    %c0_15 = arith.constant 0 : index
    %c0_16 = arith.constant 0 : index
    %12 = vector.load %arg2[%c0_12, %c0_13, %c1_14, %c0_15, %c0_16] : memref<1x1x18x18x4xf32, #tpu.memory_space<vmem>>, vector<1x1x16x16x4xf32>
    %13 = vector.shape_cast %12 : vector<1x1x16x16x4xf32> to vector<16x16x4xf32>
    %14 = vector.shape_cast %13 : vector<16x16x4xf32> to vector<256x4xf32>
    %15 = tpu.transpose %14, [1, 0] : vector<256x4xf32> -> vector<4x256xf32>
    %c0_17 = arith.constant 0 : index
    %c0_18 = arith.constant 0 : index
    %c1_19 = arith.constant 1 : index
    %c1_20 = arith.constant 1 : index
    %c0_21 = arith.constant 0 : index
    %16 = vector.load %arg2[%c0_17, %c0_18, %c1_19, %c1_20, %c0_21] : memref<1x1x18x18x4xf32, #tpu.memory_space<vmem>>, vector<1x1x16x16x4xf32>
    %17 = vector.shape_cast %16 : vector<1x1x16x16x4xf32> to vector<16x16x4xf32>
    %18 = vector.shape_cast %17 : vector<16x16x4xf32> to vector<256x4xf32>
    %19 = tpu.transpose %18, [1, 0] : vector<256x4xf32> -> vector<4x256xf32>
    %c0_22 = arith.constant 0 : index
    %c0_23 = arith.constant 0 : index
    %c1_24 = arith.constant 1 : index
    %c2_25 = arith.constant 2 : index
    %c0_26 = arith.constant 0 : index
    %20 = vector.load %arg2[%c0_22, %c0_23, %c1_24, %c2_25, %c0_26] : memref<1x1x18x18x4xf32, #tpu.memory_space<vmem>>, vector<1x1x16x16x4xf32>
    %21 = vector.shape_cast %20 : vector<1x1x16x16x4xf32> to vector<16x16x4xf32>
    %22 = vector.shape_cast %21 : vector<16x16x4xf32> to vector<256x4xf32>
    %23 = tpu.transpose %22, [1, 0] : vector<256x4xf32> -> vector<4x256xf32>
    %c0_27 = arith.constant 0 : index
    %c0_28 = arith.constant 0 : index
    %c2_29 = arith.constant 2 : index
    %c0_30 = arith.constant 0 : index
    %c0_31 = arith.constant 0 : index
    %24 = vector.load %arg2[%c0_27, %c0_28, %c2_29, %c0_30, %c0_31] : memref<1x1x18x18x4xf32, #tpu.memory_space<vmem>>, vector<1x1x16x16x4xf32>
    %25 = vector.shape_cast %24 : vector<1x1x16x16x4xf32> to vector<16x16x4xf32>
    %26 = vector.shape_cast %25 : vector<16x16x4xf32> to vector<256x4xf32>
    %27 = tpu.transpose %26, [1, 0] : vector<256x4xf32> -> vector<4x256xf32>
    %c0_32 = arith.constant 0 : index
    %c0_33 = arith.constant 0 : index
    %c2_34 = arith.constant 2 : index
    %c1_35 = arith.constant 1 : index
    %c0_36 = arith.constant 0 : index
    %28 = vector.load %arg2[%c0_32, %c0_33, %c2_34, %c1_35, %c0_36] : memref<1x1x18x18x4xf32, #tpu.memory_space<vmem>>, vector<1x1x16x16x4xf32>
    %29 = vector.shape_cast %28 : vector<1x1x16x16x4xf32> to vector<16x16x4xf32>
    %30 = vector.shape_cast %29 : vector<16x16x4xf32> to vector<256x4xf32>
    %31 = tpu.transpose %30, [1, 0] : vector<256x4xf32> -> vector<4x256xf32>
    %c0_37 = arith.constant 0 : index
    %c0_38 = arith.constant 0 : index
    %c2_39 = arith.constant 2 : index
    %c2_40 = arith.constant 2 : index
    %c0_41 = arith.constant 0 : index
    %32 = vector.load %arg2[%c0_37, %c0_38, %c2_39, %c2_40, %c0_41] : memref<1x1x18x18x4xf32, #tpu.memory_space<vmem>>, vector<1x1x16x16x4xf32>
    %33 = vector.shape_cast %32 : vector<1x1x16x16x4xf32> to vector<16x16x4xf32>
    %34 = vector.shape_cast %33 : vector<16x16x4xf32> to vector<256x4xf32>
    %35 = tpu.transpose %34, [1, 0] : vector<256x4xf32> -> vector<4x256xf32>
    %36 = tpu.concatenate %3, %7, %11, %15, %19, %23, %27, %31, %35 in 0 : vector<4x256xf32>, vector<4x256xf32>, vector<4x256xf32>, vector<4x256xf32>, vector<4x256xf32>, vector<4x256xf32>, vector<4x256xf32>, vector<4x256xf32>, vector<4x256xf32> -> vector<36x256xf32>
    %c0_42 = arith.constant 0 : index
    %c0_43 = arith.constant 0 : index
    %37 = vector.load %arg3[%c0_42, %c0_43] : memref<128x36xf32, #tpu.memory_space<vmem>>, vector<128x36xf32>
    %cst = arith.constant dense<0.000000e+00> : vector<128x256xf32>
    %38 = tpu.matmul %37, %36, %cst {dimension_numbers = #tpu.dot_dimension_numbers<[1], [0], [0], [1], [0, 0, 1, 1], [], []>} : vector<128x36xf32>, vector<36x256xf32>, vector<128x256xf32> -> vector<128x256xf32>
    %39 = vector.extract_strided_slice %38 {offsets = [0, 0], sizes = [8, 256], strides = [1, 1]} : vector<128x256xf32> to vector<8x256xf32>
    %c0_44 = arith.constant 0 : index
    %c0_45 = arith.constant 0 : index
    %c0_46 = arith.constant 0 : index
    %40 = vector.load %arg4[%c0_44, %c0_45, %c0_46] : memref<1x8x256xf32, #tpu.memory_space<vmem>>, vector<1x8x256xf32>
    %41 = vector.shape_cast %40 : vector<1x8x256xf32> to vector<8x256xf32>
    %42 = vector.shape_cast %39 : vector<8x256xf32> to vector<1x8x256xf32>
    tpu.vector_store %arg4[%c0_44, %c0_45, %c0_46], %42 {strides = array<i32>} : memref<1x8x256xf32, #tpu.memory_space<vmem>>, vector<1x8x256xf32>,
    %cst_47 = arith.constant dense<0.000000e+00> : vector<128xf32>
    %43 = vector.multi_reduction <add>, %38, %cst_47 [1] : vector<128x256xf32> to vector<128xf32>
    %44 = vector.shape_cast %43 : vector<128xf32> to vector<128x1xf32>
    %c0_48 = arith.constant 0 : index
    %c0_49 = arith.constant 0 : index
    %c0_50 = arith.constant 0 : index
    %c0_51 = arith.constant 0 : index
    %45 = vector.load %arg5[%c0_48, %c0_49, %c0_50, %c0_51] : memref<1x1x128x1xf32, #tpu.memory_space<vmem>>, vector<1x1x128x1xf32>
    %46 = vector.shape_cast %45 : vector<1x1x128x1xf32> to vector<128x1xf32>
    %47 = vector.shape_cast %44 : vector<128x1xf32> to vector<1x1x128x1xf32>
    tpu.vector_store %arg5[%c0_48, %c0_49, %c0_50, %c0_51], %47 {strides = array<i32>} : memref<1x1x128x1xf32, #tpu.memory_space<vmem>>, vector<1x1x128x1xf32>,
    %48 = arith.mulf %38, %38 : vector<128x256xf32>
    %cst_52 = arith.constant dense<0.000000e+00> : vector<128xf32>
    %49 = vector.multi_reduction <add>, %48, %cst_52 [1] : vector<128x256xf32> to vector<128xf32>
    %50 = vector.shape_cast %49 : vector<128xf32> to vector<128x1xf32>
    %c0_53 = arith.constant 0 : index
    %c0_54 = arith.constant 0 : index
    %c0_55 = arith.constant 0 : index
    %c0_56 = arith.constant 0 : index
    %51 = vector.load %arg6[%c0_53, %c0_54, %c0_55, %c0_56] : memref<1x1x128x1xf32, #tpu.memory_space<vmem>>, vector<1x1x128x1xf32>
    %52 = vector.shape_cast %51 : vector<1x1x128x1xf32> to vector<128x1xf32>
    %53 = vector.shape_cast %50 : vector<128x1xf32> to vector<1x1x128x1xf32>
    tpu.vector_store %arg6[%c0_53, %c0_54, %c0_55, %c0_56], %53 {strides = array<i32>} : memref<1x1x128x1xf32, #tpu.memory_space<vmem>>, vector<1x1x128x1xf32>,
    return
  }
  func.func @transform_0(%arg0: i32, %arg1: i32) -> (i32, i32, i32, i32, i32) {
    %c0_i32 = arith.constant 0 : i32
    %c0_i32_0 = arith.constant 0 : i32
    %c0_i32_1 = arith.constant 0 : i32
    %c0_i32_2 = arith.constant 0 : i32
    return %arg0, %arg1, %c0_i32, %c0_i32_0, %c0_i32_1 : i32, i32, i32, i32, i32
  }
  func.func @transform_1(%arg0: i32, %arg1: i32) -> (i32, i32) {
    %c0_i32 = arith.constant 0 : i32
    %c0_i32_0 = arith.constant 0 : i32
    %c0_i32_1 = arith.constant 0 : i32
    return %c0_i32, %c0_i32_0 : i32, i32
  }
  func.func @transform_2(%arg0: i32, %arg1: i32) -> (i32, i32, i32) {
    %c0_i32 = arith.constant 0 : i32
    %c0_i32_0 = arith.constant 0 : i32
    return %arg0, %c0_i32, %arg1 : i32, i32, i32
  }
  func.func @transform_3(%arg0: i32, %arg1: i32) -> (i32, i32, i32, i32) {
    %c0_i32 = arith.constant 0 : i32
    %c0_i32_0 = arith.constant 0 : i32
    %c0_i32_1 = arith.constant 0 : i32
    return %arg0, %arg1, %c0_i32, %c0_i32_0 : i32, i32, i32, i32
  }
  func.func @transform_4(%arg0: i32, %arg1: i32) -> (i32, i32, i32, i32) {
    %c0_i32 = arith.constant 0 : i32
    %c0_i32_0 = arith.constant 0 : i32
    %c0_i32_1 = arith.constant 0 : i32
    return %arg0, %arg1, %c0_i32, %c0_i32_0 : i32, i32, i32, i32
  }
}

module attributes {stable_mosaic.version = 11 : i64} {
  func.func @_bn_apply_kernel(%arg0: i32, %arg1: i32, %arg2: memref<1x8x256xf32, #tpu.memory_space<vmem>>, %arg3: memref<8x1xf32, #tpu.memory_space<vmem>>, %arg4: memref<8x1xf32, #tpu.memory_space<vmem>>, %arg5: memref<1x8x256xf32, #tpu.memory_space<vmem>>) attributes {dimension_semantics = [#tpu.dimension_semantics<parallel>, #tpu.dimension_semantics<parallel>], iteration_bounds = array<i64: 2, 1>, scalar_prefetch = 0 : i64, scratch_operands = 0 : i64, tpu.core_type = #tpu.core_type<tc>, window_params = [{transform_indices = @transform_0, window_bounds = array<i64: 1, 8, 256>}, {pipeline_mode = #tpu.pipeline_mode<synchronous>, transform_indices = @transform_1, window_bounds = array<i64: 8, 1>}, {pipeline_mode = #tpu.pipeline_mode<synchronous>, transform_indices = @transform_2, window_bounds = array<i64: 8, 1>}, {transform_indices = @transform_3, window_bounds = array<i64: 1, 8, 256>}]} {
    %c0 = arith.constant 0 : index
    %c0_0 = arith.constant 0 : index
    %c0_1 = arith.constant 0 : index
    %0 = vector.load %arg2[%c0, %c0_0, %c0_1] : memref<1x8x256xf32, #tpu.memory_space<vmem>>, vector<1x8x256xf32>
    %1 = vector.shape_cast %0 : vector<1x8x256xf32> to vector<8x256xf32>
    %c0_2 = arith.constant 0 : index
    %c0_3 = arith.constant 0 : index
    %2 = vector.load %arg3[%c0_2, %c0_3] : memref<8x1xf32, #tpu.memory_space<vmem>>, vector<8x1xf32>
    %3 = vector.broadcast %2 : vector<8x1xf32> to vector<8x256xf32>
    %4 = arith.mulf %1, %3 : vector<8x256xf32>
    %c0_4 = arith.constant 0 : index
    %c0_5 = arith.constant 0 : index
    %5 = vector.load %arg4[%c0_4, %c0_5] : memref<8x1xf32, #tpu.memory_space<vmem>>, vector<8x1xf32>
    %6 = vector.broadcast %5 : vector<8x1xf32> to vector<8x256xf32>
    %7 = arith.addf %4, %6 : vector<8x256xf32>
    %c0_6 = arith.constant 0 : index
    %c0_7 = arith.constant 0 : index
    %c0_8 = arith.constant 0 : index
    %8 = vector.load %arg5[%c0_6, %c0_7, %c0_8] : memref<1x8x256xf32, #tpu.memory_space<vmem>>, vector<1x8x256xf32>
    %9 = vector.shape_cast %8 : vector<1x8x256xf32> to vector<8x256xf32>
    %10 = vector.shape_cast %7 : vector<8x256xf32> to vector<1x8x256xf32>
    tpu.vector_store %arg5[%c0_6, %c0_7, %c0_8], %10 {strides = array<i32>} : memref<1x8x256xf32, #tpu.memory_space<vmem>>, vector<1x8x256xf32>,
    return
  }
  func.func @transform_0(%arg0: i32, %arg1: i32) -> (i32, i32, i32) {
    %c0_i32 = arith.constant 0 : i32
    %c0_i32_0 = arith.constant 0 : i32
    return %arg0, %c0_i32, %arg1 : i32, i32, i32
  }
  func.func @transform_1(%arg0: i32, %arg1: i32) -> (i32, i32) {
    %c0_i32 = arith.constant 0 : i32
    %c0_i32_0 = arith.constant 0 : i32
    %c0_i32_1 = arith.constant 0 : i32
    return %c0_i32, %c0_i32_0 : i32, i32
  }
  func.func @transform_2(%arg0: i32, %arg1: i32) -> (i32, i32) {
    %c0_i32 = arith.constant 0 : i32
    %c0_i32_0 = arith.constant 0 : i32
    %c0_i32_1 = arith.constant 0 : i32
    return %c0_i32, %c0_i32_0 : i32, i32
  }
  func.func @transform_3(%arg0: i32, %arg1: i32) -> (i32, i32, i32) {
    %c0_i32 = arith.constant 0 : i32
    %c0_i32_0 = arith.constant 0 : i32
    return %arg0, %c0_i32, %arg1 : i32, i32, i32
  }
}

</mosaic_0001>

<bundles_post_ra>
// kernel: cb_forward.3
= control target key start
LH: loop header
LB: loop body
LE: loop exit
PB: predicated region body
PF: predicated region fallthrough
CT: control target
= control target key end

     0   :  { %s401_s12 = smov 0   ;;  %s403_s13 = smov 0   ;;  %s437_s0 = inlined_call_operand.vmem [shape: f32[2,8,256], index: 0, kind: input, shape index: {}, may-alias: {0,3}]   ;;  %s438_s1 = inlined_call_operand.vmem [shape: f32[8,1], index: 1, kind: input, shape index: {}]   ;;  %s439_s2 = inlined_call_operand.vmem [shape: f32[8,1], index: 2, kind: input, shape index: {}]   ;;  %s440_s3 = inlined_call_operand.vmem [shape: f32[2,8,256], index: 3, kind: output, shape index: {}, may-alias: {0,3}]  }
   0x1   :  { %s405_s14 = smov 0  }
   0x2 LB: > { %s25_s15 = sadd.s32 1, %s374_s13  ;;  %p321_p0 = scmp.ge.s32.totalorder %s378_s14, 1  ;;  %s378_s14 = sphi %s405_s14, %s13_s14   ;;  %s374_s13 = sphi %s403_s13, %s442_s13   ;;  %s370_s12 = sphi %s401_s12, %s441_s12  }
   0x3   : > { %p27_p1 = scmp.ge.s32.totalorder %s25_s15, 2  ;;  %p158_p2 = scmp.lt.s32.totalorder %s378_s14, 3 }
   0x5   : > { %s444_s15 = smov (%p27_p1, %s25_s15), 0  ;;  %p159_p3 = pnand %p321_p0, %p158_p2 }
   0x6   : > { %v212_v0 = vld [vmem:[%s438_s1] sm:$0xff] (!%p159_p3)  ;;  %v380_v1 = vmov (!%p159_p3), 0   ;;  %p191_p4 = scmp.lt.s32.totalorder (!%p159_p3), %s370_s12, 1 }
   0x7   : > { %162 = sbr.rel (%p159_p3) target bundleno = 143 (0x8f), region = 32  ;;  %355 = vset.pattern.permute.xlu0 (!%p159_p3), %v380_v1  ;;  %v220_v2 = vld [vmem:[%s439_s2] sm:$0xff] (!%p159_p3) }
   0x8   : > { %215 = vperm.xlu0 (!%p159_p3), %355, %v212_v0  }
   0xc   : > { %223 = vperm.xlu0 (!%p159_p3), %355, %v220_v2  }
   0xe   : > { %s446_s12 = smov (!%p191_p4, %s370_s12), 1 }
   0xf   : > { %s328_s20 = sshll.u32 %s446_s12, 4 }
  0x10   : > { %s198_s23 = scalar_lea.vmem %s437_s0, %s328_s20  ;;  %s208_s26 = scalar_lea.vmem %s440_s3, %s328_s20 }
  0x11   : > { %v210_v4 = vld [vmem:[%s198_s23] sm:$0xff]  ;;  %v211_v5 = vld [vmem:[%s198_s23 + $0x8] sm:$0xff] }
  0x87   : > { %v216_v3 = vpop.permute.xlu0 %215 }
  0x88   : > { %v218_v6 = vmul.f32 %v216_v3, %v210_v4  ;;  %v219_v7 = vmul.f32 %v216_v3, %v211_v5 }
  0x8b   : > { %v224_v8 = vpop.permute.xlu0 %223 }
  0x8c   : > { %v226_v9 = vadd.f32 %v224_v8, %v218_v6  ;;  %v227_v10 = vadd.f32 %v224_v8, %v219_v7 }
  0x8e   : > { %228 = vst [vmem:[%s208_s26] sm:$0xff] %v226_v9  ;;  %229 = vst [vmem:[%s208_s26 + $0x8] sm:$0xff] %v227_v10 }
  0x8f PF: > { %s13_s14 = sadd.s32 1, %s378_s14   ;;  %s441_s12 = smov %s374_s13 }
  0x90   : > { %p10_p5 = scmp.ge.s32.totalorder %s13_s14, 4   ;;  %s442_s13 = smov %s444_s15 }
  0x92   :  { %12 = sbr.rel (!%p10_p5) target bundleno = 2 (0x2), region = 62 }

// kernel: cb_forward.2
= control target key start
LH: loop header
LB: loop body
LE: loop exit
PB: predicated region body
PF: predicated region fallthrough
CT: control target
= control target key end

     0   :  { %s2383_s15 = smov 0   ;;  %s2385_s16 = smov 0   ;;  %s3228_s0 = inlined_call_operand.vmem [shape: f32[2,1,18,18,4], index: 0, kind: input, shape index: {}]   ;;  %s3229_s1 = inlined_call_operand.vmem [shape: f32[128,36], index: 1, kind: input, shape index: {}]   ;;  %s3230_s2 = inlined_call_operand.vmem [shape: f32[2,8,256], index: 2, kind: output, shape index: {0}]   ;;  %s3231_s3 = inlined_call_operand.vmem [shape: f32[2,1,128,1], index: 3, kind: output, shape index: {1}]   ;;  %s3232_s4 = inlined_call_operand.vmem [shape: f32[2,1,128,1], index: 4, kind: output, shape index: {2}]  }
   0x1   :  { %s2387_s17 = smov 0  }
   0x2 LB: > { %s27_s18 = sadd.s32 1, %s2351_s16  ;;  %p1774_p0 = scmp.ge.s32.totalorder %s2355_s17, 1  ;;  %s2355_s17 = sphi %s2387_s17, %s15_s17   ;;  %s2351_s16 = sphi %s2385_s16, %s3381_s16   ;;  %s2347_s15 = sphi %s2383_s15, %s3380_s15  }
   0x3   : > { %p29_p1 = scmp.ge.s32.totalorder %s27_s18, 2  ;;  %p191_p2 = scmp.lt.s32.totalorder %s2355_s17, 3 }
   0x5   : > { %s3383_s18 = smov (%p29_p1, %s27_s18), 0  ;;  %p192_p3 = pnand %p1774_p0, %p191_p2 }
   0x7   : > { %195 = sbr.rel (%p192_p3) target bundleno = 838 (0x346), region = 28 }
   0xe   : > { %p243_p4 = scmp.lt.s32.totalorder %s2347_s15, 1  ;;  %vm1170_vm0 = vcmask 1043456   ;;  %vm1195_vm1 = vcmask 293888   ;;  %vm1461_vm2 = vcmask 7168  }
  0x10   : > { %s3385_s15 = smov (!%p243_p4, %s2347_s15), 1 }
  0x11   : > { %s2011_s19 = smul.u32 432, %s3385_s15  ;;  %s1994_s7 = sshll.u32 %s3385_s15, 4 }
  0x12   : > { %s260_s10 = scalar_lea.vmem %s3230_s2, %s1994_s7  ;;  %s1995_s11 = sshll.u32 %s3385_s15, 7 }
  0x13   : > { %s2407_s22 = scalar_lea.vmem %s3228_s0, %s2011_s19  ;;  %s3148_s14 = scalar_lea.vmem %s3231_s3, %s1995_s11 }
  0x14   : > { %v280_v0 = vld [vmem:[%s2407_s22] sm:$0xff]  ;;  %v281_v5 = vld [vmem:[%s2407_s22 + $0x8] sm:$0xff]  ;;  %v282_v12 = vld [vmem:[%s2407_s22 + $0x18] sm:$0xff]  ;;  %s3159_s20 = scalar_lea.vmem %s3232_s4, %s1995_s11 }
  0x15   : > { %v2411_v1 = vld [vmem:[%s2407_s22 + $0xc0] sm:$0xff]  ;;  %v2420_v6 = vld [vmem:[%s2407_s22 + $0xc8] sm:$0xff]  ;;  %v2431_v13 = vld [vmem:[%s2407_s22 + $0xd8] sm:$0xff] }
  0x16   : > { %3288 = vst [vmem:[#allocation2_spill] sm:$0xff] %v2411_v1  ;;  %v376_v2 = vld [vmem:[%s2407_s22 + $0x1] sm:$0xff]  ;;  %v2037_v3 = vpack.i.bf16 %v2411_v1, %v280_v0  ;;  %v377_v8 = vld [vmem:[%s2407_s22 + $0x9] sm:$0xff]  ;;  %v2039_v10 = vpack.i.bf16 %v2420_v6, %v281_v5  ;;  %3289 = vst [vmem:[#allocation3_spill] sm:$0xff] %v2431_v13  ;;  %v2438_v16 = vpack.i.bf16 %v2431_v13, %v282_v12 }
  0x17   : > { %v2416_v4 = vld [vmem:[%s2407_s22 + $0xc1] sm:$0xff]  ;;  %v2425_v9 = vld [vmem:[%s2407_s22 + $0xc9] sm:$0xff]  ;;  %v378_v14 = vld [vmem:[%s2407_s22 + $0x19] sm:$0xff] }
  0x18   : > { %v2074_v7 = vpack.i.bf16 %v2416_v4, %v376_v2  ;;  %2038 = vxpose.xlu0.b32.start [1/16] (narrow) %v2037_v3, 8  ;;  %v2076_v11 = vpack.i.bf16 %v2425_v9, %v377_v8  ;;  %v2435_v15 = vld [vmem:[%s2407_s22 + $0xd9] sm:$0xff]  ;;  %v379_v20 = vld [vmem:[%s2407_s22 + $0x21] sm:$0xff]  ;;  %v2460_v24 = vld [vmem:[%s2407_s22 + $0x30] sm:$0xff] }
  0x19   : > { %3290 = vst [vmem:[#allocation4_spill] sm:$0xff] %v2435_v15  ;;  %v2441_v17 = vpack.i.bf16 %v2435_v15, %v378_v14  ;;  %v283_v18 = vld [vmem:[%s2407_s22 + $0x20] sm:$0xff]  ;;  %v2463_v25 = vld [vmem:[%s2407_s22 + $0xf0] sm:$0xff]  ;;  %v2482_v30 = vld [vmem:[%s2407_s22 + $0x38] sm:$0xff] }
  0x1a   : > { %2075 = vxpose.xlu1.b32.start [1/16] (narrow) %v2074_v7, 8  ;;  %v2445_v19 = vld [vmem:[%s2407_s22 + $0xe0] sm:$0xff]  ;;  %v2466_v26 = vld [vmem:[%s2407_s22 + $0x31] sm:$0xff]  ;;  %v2474_v28 = vpack.i.bf16 %v2463_v25, %v2460_v24  ;;  %v2504_v36 = vld [vmem:[%s2407_s22 + $0x48] sm:$0xff] }
  0x1b   : > { %3291 = vst [vmem:[#allocation5_spill] sm:$0xff] %v2445_v19  ;;  %v2449_v21 = vld [vmem:[%s2407_s22 + $0xe1] sm:$0xff]  ;;  %v2453_v22 = vpack.i.bf16 %v2445_v19, %v283_v18  ;;  %v2469_v27 = vld [vmem:[%s2407_s22 + $0xf1] sm:$0xff]  ;;  %v2488_v32 = vld [vmem:[%s2407_s22 + $0x39] sm:$0xff] }
  0x1c   : > { %2040 = vxpose.xlu0.b32.cont [2/16] (narrow) %v2039_v10, 8  ;;  %3292 = vst [vmem:[#allocation6_spill] sm:$0xff] %v2449_v21  ;;  %v2457_v23 = vpack.i.bf16 %v2449_v21, %v379_v20  ;;  %v2479_v29 = vpack.i.bf16 %v2469_v27, %v2466_v26  ;;  %v2485_v31 = vld [vmem:[%s2407_s22 + $0xf8] sm:$0xff]  ;;  %3293 = vst [vmem:[#allocation7_spill] sm:$0xff] %v2504_v36  ;;  %v2507_v37 = vld [vmem:[%s2407_s22 + $0x108] sm:$0xff] }
  0x1d   : > { %v2491_v33 = vld [vmem:[%s2407_s22 + $0xf9] sm:$0xff]  ;;  %v2496_v34 = vpack.i.bf16 %v2485_v31, %v2482_v30  ;;  %v2510_v38 = vld [vmem:[%s2407_s22 + $0x49] sm:$0xff]  ;;  %v2518_v40 = vpack.i.bf16 %v2507_v37, %v2504_v36  ;;  %v2532_v44 = vld [vmem:[%s2407_s22 + $0x51] sm:$0xff] }
  0x1e   : > { %2077 = vxpose.xlu1.b32.cont [2/16] (narrow) %v2076_v11, 8  ;;  %v2501_v35 = vpack.i.bf16 %v2491_v33, %v2488_v32  ;;  %v2513_v39 = vld [vmem:[%s2407_s22 + $0x109] sm:$0xff]  ;;  %3296 = vst [vmem:[#allocation10_spill] sm:$0xff] %v2532_v44  ;;  %v2535_v45 = vld [vmem:[%s2407_s22 + $0x111] sm:$0xff]  ;;  %v2548_v48 = vld [vmem:[%s2407_s22 + $0x60] sm:$0xff] }
  0x1f   : > { %v2523_v41 = vpack.i.bf16 %v2513_v39, %v2510_v38  ;;  %v2526_v42 = vld [vmem:[%s2407_s22 + $0x50] sm:$0xff]  ;;  %v2545_v47 = vpack.i.bf16 %v2535_v45, %v2532_v44  ;;  %3297 = vst [vmem:[#allocation11_spill] sm:$0xff] %v2548_v48  ;;  %v2551_v49 = vld [vmem:[%s2407_s22 + $0x120] sm:$0xff]  ;;  %v2570_v54 = vld [vmem:[%s2407_s22 + $0x68] sm:$0xff] }
  0x20   : > { %2042 = vxpose.xlu0.b32.cont [3/16] (narrow) %v2438_v16, 8  ;;  %3294 = vst [vmem:[#allocation8_spill] sm:$0xff] %v2526_v42  ;;  %v2529_v43 = vld [vmem:[%s2407_s22 + $0x110] sm:$0xff]  ;;  %3298 = vst [vmem:[#allocation12_spill] sm:$0xff] %v2551_v49  ;;  %v2554_v50 = vld [vmem:[%s2407_s22 + $0x61] sm:$0xff]  ;;  %v2562_v52 = vpack.i.bf16 %v2551_v49, %v2548_v48 }
  0x21   : > { %3295 = vst [vmem:[#allocation9_spill] sm:$0xff] %v2529_v43  ;;  %v2540_v46 = vpack.i.bf16 %v2529_v43, %v2526_v42  ;;  %3299 = vst [vmem:[#allocation13_spill] sm:$0xff] %v2554_v50  ;;  %v2557_v51 = vld [vmem:[%s2407_s22 + $0x121] sm:$0xff]  ;;  %v2576_v56 = vld [vmem:[%s2407_s22 + $0x69] sm:$0xff] }
  0x22   : > { %2079 = vxpose.xlu1.b32.cont [3/16] (narrow) %v2441_v17, 8  ;;  %v2567_v53 = vpack.i.bf16 %v2557_v51, %v2554_v50  ;;  %3300 = vst [vmem:[#allocation14_spill] sm:$0xff] %v2570_v54  ;;  %v2573_v55 = vld [vmem:[%s2407_s22 + $0x128] sm:$0xff]  ;;  %3302 = vst [vmem:[#allocation16_spill] sm:$0xff] %v2576_v56  ;;  %v2592_v60 = vld [vmem:[%s2407_s22 + $0x78] sm:$0xff] }
  0x23   : > { %3301 = vst [vmem:[#allocation15_spill] sm:$0xff] %v2573_v55  ;;  %v2579_v57 = vld [vmem:[%s2407_s22 + $0x129] sm:$0xff]  ;;  %v2584_v58 = vpack.i.bf16 %v2573_v55, %v2570_v54  ;;  %3303 = vst [vmem:[#allocation17_spill] sm:$0xff] %v2592_v60  ;;  %v2595_v61 = vld [vmem:[%s2407_s22 + $0x138] sm:$0xff] }
  0x24   : > { %2044 = vxpose.xlu0.b32.cont [4/16] (narrow) %v2453_v22, 8  ;;  %v2589_v59 = vpack.i.bf16 %v2579_v57, %v2576_v56  ;;  %3304 = vst [vmem:[#allocation18_spill] sm:$0xff] %v2595_v61  ;;  %v2598_v62 = vld [vmem:[%s2407_s22 + $0x79] sm:$0xff]  ;;  %v2606_v0 = vpack.i.bf16 %v2595_v61, %v2592_v60  ;;  %v2620_v7 = vld [vmem:[%s2407_s22 + $0x81] sm:$0xff]  ;;  %v2636_v12 = vld [vmem:[%s2407_s22 + $0x90] sm:$0xff] }
  0x25   : > { %3305 = vst [vmem:[#allocation19_spill] sm:$0xff] %v2598_v62  ;;  %v2601_v63 = vld [vmem:[%s2407_s22 + $0x139] sm:$0xff]  ;;  %3308 = vst [vmem:[#allocation22_spill] sm:$0xff] %v2620_v7  ;;  %v2623_v8 = vld [vmem:[%s2407_s22 + $0x141] sm:$0xff] }
  0x26   : > { %2081 = vxpose.xlu1.b32.cont [4/16] (narrow) %v2457_v23, 8  ;;  %v2611_v2 = vpack.i.bf16 %v2601_v63, %v2598_v62  ;;  %v2614_v3 = vld [vmem:[%s2407_s22 + $0x80] sm:$0xff]  ;;  %v2633_v11 = vpack.i.bf16 %v2623_v8, %v2620_v7  ;;  %3309 = vst [vmem:[#allocation23_spill] sm:$0xff] %v2636_v12  ;;  %v2639_v14 = vld [vmem:[%s2407_s22 + $0x150] sm:$0xff]  ;;  %v2658_v13 = vld [vmem:[%s2407_s22 + $0x98] sm:$0xff] }
  0x27   : > { %3306 = vst [vmem:[#allocation20_spill] sm:$0xff] %v2614_v3  ;;  %v2617_v5 = vld [vmem:[%s2407_s22 + $0x140] sm:$0xff]  ;;  %3310 = vst [vmem:[#allocation24_spill] sm:$0xff] %v2639_v14  ;;  %v2642_v18 = vld [vmem:[%s2407_s22 + $0x91] sm:$0xff]  ;;  %v2650_v19 = vpack.i.bf16 %v2639_v14, %v2636_v12 }
  0x28   : > { %2046 = vxpose.xlu0.b32.cont [5/16] (narrow) %v2474_v28, 8  ;;  %3307 = vst [vmem:[#allocation21_spill] sm:$0xff] %v2617_v5  ;;  %v2628_v10 = vpack.i.bf16 %v2617_v5, %v2614_v3  ;;  %3311 = vst [vmem:[#allocation25_spill] sm:$0xff] %v2642_v18  ;;  %v2645_v20 = vld [vmem:[%s2407_s22 + $0x151] sm:$0xff]  ;;  %v2664_v3 = vld [vmem:[%s2407_s22 + $0x99] sm:$0xff] }
  0x29   : > { %v2655_v21 = vpack.i.bf16 %v2645_v20, %v2642_v18  ;;  %3312 = vst [vmem:[#allocation26_spill] sm:$0xff] %v2658_v13  ;;  %v2661_v15 = vld [vmem:[%s2407_s22 + $0x158] sm:$0xff]  ;;  %3314 = vst [vmem:[#allocation28_spill] sm:$0xff] %v2664_v3  ;;  %v2680_v18 = vld [vmem:[%s2407_s22 + $0xa8] sm:$0xff] }
  0x2a   : > { %2083 = vxpose.xlu1.b32.cont [5/16] (narrow) %v2479_v29, 8  ;;  %3313 = vst [vmem:[#allocation27_spill] sm:$0xff] %v2661_v15  ;;  %v2667_v5 = vld [vmem:[%s2407_s22 + $0x159] sm:$0xff]  ;;  %v2672_v12 = vpack.i.bf16 %v2661_v15, %v2658_v13  ;;  %3315 = vst [vmem:[#allocation29_spill] sm:$0xff] %v2680_v18  ;;  %v2683_v7 = vld [vmem:[%s2407_s22 + $0x168] sm:$0xff] }
  0x2b   : > { %v2677_v14 = vpack.i.bf16 %v2667_v5, %v2664_v3  ;;  %3316 = vst [vmem:[#allocation30_spill] sm:$0xff] %v2683_v7  ;;  %v2686_v60 = vld [vmem:[%s2407_s22 + $0xa9] sm:$0xff]  ;;  %v2694_v13 = vpack.i.bf16 %v2683_v7, %v2680_v18  ;;  %v2708_v54 = vld [vmem:[%s2407_s22 + $0xb1] sm:$0xff]  ;;  %v2730_v49 = vld [vmem:[%s2407_s22 + $0x1a] sm:$0xff] }
  0x2c   : > { %2048 = vxpose.xlu0.b32.cont [6/16] (narrow) %v2496_v34, 8  ;;  %3317 = vst [vmem:[#allocation31_spill] sm:$0xff] %v2686_v60  ;;  %v2689_v61 = vld [vmem:[%s2407_s22 + $0x169] sm:$0xff]  ;;  %3320 = vst [vmem:[#allocation34_spill] sm:$0xff] %v2708_v54  ;;  %v2711_v55 = vld [vmem:[%s2407_s22 + $0x171] sm:$0xff] }
  0x2d   : > { %v2699_v15 = vpack.i.bf16 %v2689_v61, %v2686_v60  ;;  %v2702_v3 = vld [vmem:[%s2407_s22 + $0xb0] sm:$0xff]  ;;  %v2721_v7 = vpack.i.bf16 %v2711_v55, %v2708_v54  ;;  %v472_v60 = vld [vmem:[%s2407_s22 + $0x2] sm:$0xff] }
  0x2e   : > { %2085 = vxpose.xlu1.b32.cont [6/16] (narrow) %v2501_v35, 8  ;;  %3318 = vst [vmem:[#allocation32_spill] sm:$0xff] %v2702_v3  ;;  %v2705_v62 = vld [vmem:[%s2407_s22 + $0x170] sm:$0xff]  ;;  %v2725_v56 = vld [vmem:[%s2407_s22 + $0xc2] sm:$0xff] }
  0x2f   : > { %3319 = vst [vmem:[#allocation33_spill] sm:$0xff] %v2705_v62  ;;  %v2716_v18 = vpack.i.bf16 %v2705_v62, %v2702_v3  ;;  %3321 = vst [vmem:[#allocation35_spill] sm:$0xff] %v2725_v56  ;;  %v2111_v48 = vpack.i.bf16 %v2725_v56, %v472_v60  ;;  %v473_v3 = vld [vmem:[%s2407_s22 + $0xa] sm:$0xff]  ;;  %v2743_v60 = vld [vmem:[%s2407_s22 + $0x22] sm:$0xff] }
  0x30   : > { %2050 = vxpose.xlu0.b32.cont [7/16] (narrow) %v2518_v40, 8  ;;  %v2735_v62 = vld [vmem:[%s2407_s22 + $0xca] sm:$0xff]  ;;  %v2747_v56 = vld [vmem:[%s2407_s22 + $0xda] sm:$0xff]  ;;  %v2763_v43 = vld [vmem:[%s2407_s22 + $0x32] sm:$0xff] }
  0x31   : > { %3322 = vst [vmem:[#allocation36_spill] sm:$0xff] %v2735_v62  ;;  %v2113_v42 = vpack.i.bf16 %v2735_v62, %v473_v3  ;;  %v2757_v3 = vld [vmem:[%s2407_s22 + $0xe2] sm:$0xff]  ;;  %v2781_v54 = vld [vmem:[%s2407_s22 + $0x4a] sm:$0xff]  ;;  %v2790_v62 = vld [vmem:[%s2407_s22 + $0x52] sm:$0xff] }
  0x32   : > { %2087 = vxpose.xlu1.b32.cont [7/16] (narrow) %v2523_v41, 8  ;;  %3324 = vst [vmem:[#allocation38_spill] sm:$0xff] %v2781_v54  ;;  %3325 = vst [vmem:[#allocation39_spill] sm:$0xff] %v2790_v62  ;;  %v2799_v44 = vld [vmem:[%s2407_s22 + $0x62] sm:$0xff] }
  0x33   : > { %3326 = vst [vmem:[#allocation40_spill] sm:$0xff] %v2799_v44 }
  0x34   : > { %2052 = vxpose.xlu0.b32.cont [8/16] (narrow) %v2540_v46, 8 }
  0x36   : > { %2089 = vxpose.xlu1.b32.cont [8/16] (narrow) %v2545_v47, 8 }
  0x38   : > { %2054 = vxpose.xlu0.b32.cont [9/16] (narrow) %v2562_v52, 8 }
  0x3a   : > { %2091 = vxpose.xlu1.b32.cont [9/16] (narrow) %v2567_v53, 8 }
  0x3c   : > { %2056 = vxpose.xlu0.b32.cont [10/16] (narrow) %v2584_v58, 8 }
  0x3e   : > { %2093 = vxpose.xlu1.b32.cont [10/16] (narrow) %v2589_v59, 8 }
  0x40   : > { %2058 = vxpose.xlu0.b32.cont [11/16] (narrow) %v2606_v0, 8 }
  0x42   : > { %2095 = vxpose.xlu1.b32.cont [11/16] (narrow) %v2611_v2, 8 }
  0x44   : > { %2060 = vxpose.xlu0.b32.cont [12/16] (narrow) %v2628_v10, 8 }
  0x46   : > { %2097 = vxpose.xlu1.b32.cont [12/16] (narrow) %v2633_v11, 8 }
  0x48   : > { %2062 = vxpose.xlu0.b32.cont [13/16] (narrow) %v2650_v19, 8 }
  0x4a   : > { %2099 = vxpose.xlu1.b32.cont [13/16] (narrow) %v2655_v21, 8 }
  0x4c   : > { %2064 = vxpose.xlu0.b32.cont [14/16] (narrow) %v2672_v12, 8 }
  0x4e   : > { %2101 = vxpose.xlu1.b32.cont [14/16] (narrow) %v2677_v14, 8 }
  0x50   : > { %2066 = vxpose.xlu0.b32.cont [15/16] (narrow) %v2694_v13, 8 }
  0x52   : > { %2103 = vxpose.xlu1.b32.cont [15/16] (narrow) %v2699_v15, 8 }
  0x54   : > { %2068 = vxpose.xlu0.b32.end [16/16] (narrow) %v2716_v18, 8 }
  0x56   : > { %2105 = vxpose.xlu1.b32.end [16/16] (narrow) %v2721_v7, 8 }
  0x58   : > { %2112 = vxpose.xlu0.b32.start [1/16] (narrow) %v2111_v48, 8  ;;  %v2115_v48 = vpack.i.bf16 %v2747_v56, %v2730_v49 }
  0x5a   : > { %2149 = vxpose.xlu1.b32.start [1/16] (narrow) %v2438_v16, 8  ;;  %v2117_v16 = vpack.i.bf16 %v2757_v3, %v2743_v60 }
  0x5c   : > { %2114 = vxpose.xlu0.b32.cont [2/16] (narrow) %v2113_v42, 8  ;;  %v2766_v42 = vld [vmem:[%s2407_s22 + $0xf2] sm:$0xff] }
  0x5d   : > { %v2119_v50 = vpack.i.bf16 %v2766_v42, %v2763_v43 }
  0x5e   : > { %2151 = vxpose.xlu1.b32.cont [2/16] (narrow) %v2453_v22, 8  ;;  %v2772_v22 = vld [vmem:[%s2407_s22 + $0x3a] sm:$0xff] }
  0x5f   : > { %3323 = vst [vmem:[#allocation37_spill] sm:$0xff] %v2772_v22 }
  0x60   : > { %2116 = vxpose.xlu0.b32.cont [3/16] (narrow) %v2115_v48, 8  ;;  %v2775_v48 = vld [vmem:[%s2407_s22 + $0xfa] sm:$0xff] }
  0x62   : > { %2153 = vxpose.xlu1.b32.cont [3/16] (narrow) %v2474_v28, 8  ;;  %v2121_v28 = vpack.i.bf16 %v2775_v48, %v2772_v22  ;;  %v2859_v22 = vld [vmem:[%s2407_s22 + $0x180] sm:$0xff] }
  0x64   : > { %2118 = vxpose.xlu0.b32.cont [4/16] (narrow) %v2117_v16, 8  ;;  %v2784_v16 = vld [vmem:[%s2407_s22 + $0x10a] sm:$0xff] }
  0x66   : > { %2155 = vxpose.xlu1.b32.cont [4/16] (narrow) %v2496_v34, 8  ;;  %v2123_v34 = vpack.i.bf16 %v2784_v16, %v2781_v54  ;;  %v2808_v54 = vld [vmem:[%s2407_s22 + $0x6a] sm:$0xff] }
  0x67   : > { %3327 = vst [vmem:[#allocation41_spill] sm:$0xff] %v2808_v54 }
  0x68   : > { %2120 = vxpose.xlu0.b32.cont [5/16] (narrow) %v2119_v50, 8  ;;  %v2793_v50 = vld [vmem:[%s2407_s22 + $0x112] sm:$0xff] }
  0x6a   : > { %2157 = vxpose.xlu1.b32.cont [5/16] (narrow) %v2518_v40, 8  ;;  %v2125_v40 = vpack.i.bf16 %v2793_v50, %v2790_v62  ;;  %v2817_v62 = vld [vmem:[%s2407_s22 + $0x7a] sm:$0xff] }
  0x6b   : > { %3328 = vst [vmem:[#allocation42_spill] sm:$0xff] %v2817_v62 }
  0x6c   : > { %2122 = vxpose.xlu0.b32.cont [6/16] (narrow) %v2121_v28, 8  ;;  %v2802_v28 = vld [vmem:[%s2407_s22 + $0x122] sm:$0xff] }
  0x6e   : > { %2159 = vxpose.xlu1.b32.cont [6/16] (narrow) %v2540_v46, 8  ;;  %v2127_v46 = vpack.i.bf16 %v2802_v28, %v2799_v44  ;;  %v2826_v44 = vld [vmem:[%s2407_s22 + $0x82] sm:$0xff] }
  0x6f   : > { %3329 = vst [vmem:[#allocation43_spill] sm:$0xff] %v2826_v44 }
  0x70   : > { %2124 = vxpose.xlu0.b32.cont [7/16] (narrow) %v2123_v34, 8  ;;  %v2811_v34 = vld [vmem:[%s2407_s22 + $0x12a] sm:$0xff] }
  0x72   : > { %2161 = vxpose.xlu1.b32.cont [7/16] (narrow) %v2562_v52, 8  ;;  %v2129_v52 = vpack.i.bf16 %v2811_v34, %v2808_v54  ;;  %v2835_v54 = vld [vmem:[%s2407_s22 + $0x92] sm:$0xff] }
  0x73   : > { %3330 = vst [vmem:[#allocation44_spill] sm:$0xff] %v2835_v54 }
  0x74   : > { %2126 = vxpose.xlu0.b32.cont [8/16] (narrow) %v2125_v40, 8  ;;  %v2820_v40 = vld [vmem:[%s2407_s22 + $0x13a] sm:$0xff] }
  0x76   : > { %2163 = vxpose.xlu1.b32.cont [8/16] (narrow) %v2584_v58, 8  ;;  %v2131_v58 = vpack.i.bf16 %v2820_v40, %v2817_v62  ;;  %v2844_v62 = vld [vmem:[%s2407_s22 + $0x9a] sm:$0xff] }
  0x77   : > { %3331 = vst [vmem:[#allocation45_spill] sm:$0xff] %v2844_v62 }
  0x78   : > { %2128 = vxpose.xlu0.b32.cont [9/16] (narrow) %v2127_v46, 8  ;;  %v2829_v46 = vld [vmem:[%s2407_s22 + $0x142] sm:$0xff] }
  0x7a   : > { %2165 = vxpose.xlu1.b32.cont [9/16] (narrow) %v2606_v0, 8  ;;  %v2133_v0 = vpack.i.bf16 %v2829_v46, %v2826_v44  ;;  %v2853_v44 = vld [vmem:[%s2407_s22 + $0xaa] sm:$0xff] }
  0x7c   : > { %2130 = vxpose.xlu0.b32.cont [10/16] (narrow) %v2129_v52, 8  ;;  %v2838_v52 = vld [vmem:[%s2407_s22 + $0x152] sm:$0xff] }
  0x7e   : > { %2167 = vxpose.xlu1.b32.cont [10/16] (narrow) %v2628_v10, 8  ;;  %v2135_v10 = vpack.i.bf16 %v2838_v52, %v2835_v54  ;;  %v2867_v54 = vld [vmem:[%s2407_s22 + $0xb2] sm:$0xff] }
  0x80   : > { %2132 = vxpose.xlu0.b32.cont [11/16] (narrow) %v2131_v58, 8  ;;  %v2847_v58 = vld [vmem:[%s2407_s22 + $0x15a] sm:$0xff] }
  0x82   : > { %2169 = vxpose.xlu1.b32.cont [11/16] (narrow) %v2650_v19, 8  ;;  %v2137_v19 = vpack.i.bf16 %v2847_v58, %v2844_v62  ;;  %v2870_v62 = vld [vmem:[%s2407_s22 + $0x172] sm:$0xff] }
  0x83   : > { %v2141_v36 = vpack.i.bf16 %v2870_v62, %v2867_v54 }
  0x84   : > { %2134 = vxpose.xlu0.b32.cont [12/16] (narrow) %v2133_v0, 8  ;;  %v2856_v0 = vld [vmem:[%s2407_s22 + $0x16a] sm:$0xff] }
  0x86   : > { %2171 = vxpose.xlu1.b32.cont [12/16] (narrow) %v2672_v12, 8  ;;  %v2139_v12 = vpack.i.bf16 %v2856_v0, %v2853_v44 }
  0x88   : > { %2136 = vxpose.xlu0.b32.cont [13/16] (narrow) %v2135_v10, 8  ;;  %v2176_v10 = vpack.i.bf16 %v2859_v22, %v2411_v1  ;;  %v2224_v1 = vpack.i.bf16 %v2491_v33, %v2757_v3  ;;  %v2240_v33 = vpack.i.bf16 %v2667_v5, %v2829_v46 }
  0x8a   : > { %2173 = vxpose.xlu1.b32.cont [13/16] (narrow) %v2694_v13, 8  ;;  %v2873_v13 = vld [vmem:[%s2407_s22 + $0x188] sm:$0xff] }
  0x8c   : > { %2138 = vxpose.xlu0.b32.cont [14/16] (narrow) %v2137_v19, 8  ;;  %v2178_v19 = vpack.i.bf16 %v2873_v13, %v2420_v6 }
  0x8e   : > { %2175 = vxpose.xlu1.b32.cont [14/16] (narrow) %v2716_v18, 8  ;;  %v2222_v18 = vpack.i.bf16 %v2469_v27, %v2747_v56  ;;  %v2236_v27 = vpack.i.bf16 %v2623_v8, %v2811_v34 }
  0x90   : > { %2140 = vxpose.xlu0.b32.cont [15/16] (narrow) %v2139_v12, 8  ;;  %v2226_v12 = vpack.i.bf16 %v2513_v39, %v2766_v42  ;;  %v2244_v39 = vpack.i.bf16 %v2711_v55, %v2847_v58 }
  0x92   : > { %2177 = vxpose.xlu1.b32.cont [15/16] (narrow) %v2176_v10, 8 }
  0x94   : > { %2142 = vxpose.xlu0.b32.end [16/16] (narrow) %v2141_v36, 8  ;;  %v2228_v36 = vpack.i.bf16 %v2535_v45, %v2775_v48 }
  0x96   : > { %2179 = vxpose.xlu1.b32.end [16/16] (narrow) %v2178_v19, 8 }
  0x98   : > { %2186 = vxpose.xlu0.b32.start [1/16] (narrow) %v2441_v17, 8  ;;  %v2230_v17 = vpack.i.bf16 %v2557_v51, %v2784_v16  ;;  %v2069_v5 = vpop.trf.xlu0 }
  0x99   : > { %v2073_v10 = vunpack.i.h.bf16 %v2069_v5  ;;  %v2070_v19 = vunpack.i.l.bf16 %v2069_v5  ;;  %v3345_v5 = vld [vmem:[#allocation39_spill] sm:$0xff] }
  0x9a   : > { %2223 = vxpose.xlu1.b32.start [1/16] (narrow) %v2222_v18, 8  ;;  %v3333_v18 = vpack.i.bf16 %v2460_v24, %v2463_v25  ;;  %v3335_v25 = vpack.i.bf16 %v2482_v30, %v2485_v31  ;;  %v3341_v30 = vld [vmem:[#allocation38_spill] sm:$0xff]  ;;  %v3342_v31 = vld [vmem:[#allocation13_spill] sm:$0xff] }
  0x9c   : > { %2188 = vxpose.xlu0.b32.cont [2/16] (narrow) %v2457_v23, 8  ;;  %v2234_v23 = vpack.i.bf16 %v2601_v63, %v2802_v28 }
  0x9e   : > { %2225 = vxpose.xlu1.b32.cont [2/16] (narrow) %v2224_v1, 8  ;;  %v2232_v1 = vpack.i.bf16 %v2579_v57, %v2793_v50 }
  0xa0   : > { %2190 = vxpose.xlu0.b32.cont [3/16] (narrow) %v2479_v29, 8  ;;  %v2238_v29 = vpack.i.bf16 %v2645_v20, %v2820_v40 }
  0xa2   : > { %2227 = vxpose.xlu1.b32.cont [3/16] (narrow) %v2226_v12, 8  ;;  %v2263_v12 = vpack.i.bf16 %v2510_v38, %v2763_v43  ;;  %v3336_v38 = vld [vmem:[#allocation7_spill] sm:$0xff] }
  0xa4   : > { %2192 = vxpose.xlu0.b32.cont [4/16] (narrow) %v2501_v35, 8  ;;  %v2242_v35 = vpack.i.bf16 %v2689_v61, %v2838_v52  ;;  %v1941_v61 = vld [vmem:[%s2407_s22 + $0x1a1] sm:$0xff] }
  0xa6   : > { %2229 = vxpose.xlu1.b32.cont [4/16] (narrow) %v2228_v36, 8 }
  0xa8   : > { %2194 = vxpose.xlu0.b32.cont [5/16] (narrow) %v2523_v41, 8  ;;  %v1938_v41 = vld [vmem:[%s2407_s22 + $0x181] sm:$0xff] }
  0xa9   : > { %v2246_v45 = vpack.i.bf16 %v1938_v41, %v2856_v0  ;;  %v2213_v55 = vpack.i.bf16 %v1938_v41, %v2416_v4 }
  0xaa   : > { %2231 = vxpose.xlu1.b32.cont [5/16] (narrow) %v2230_v17, 8 }
  0xac   : > { %2196 = vxpose.xlu0.b32.cont [6/16] (narrow) %v2545_v47, 8  ;;  %v1939_v47 = vld [vmem:[%s2407_s22 + $0x189] sm:$0xff] }
  0xad   : > { %v2248_v51 = vpack.i.bf16 %v1939_v47, %v2870_v62  ;;  %v2215_v63 = vpack.i.bf16 %v1939_v47, %v2425_v9 }
  0xae   : > { %2233 = vxpose.xlu1.b32.cont [6/16] (narrow) %v2232_v1, 8 }
  0xb0   : > { %2198 = vxpose.xlu0.b32.cont [7/16] (narrow) %v2567_v53, 8  ;;  %v2921_v53 = vld [vmem:[%s2407_s22 + $0x182] sm:$0xff] }
  0xb2   : > { %2235 = vxpose.xlu1.b32.cont [7/16] (narrow) %v2234_v23, 8 }
  0xb4   : > { %2200 = vxpose.xlu0.b32.cont [8/16] (narrow) %v2589_v59, 8  ;;  %v2928_v59 = vld [vmem:[%s2407_s22 + $0x18a] sm:$0xff] }
  0xb6   : > { %2237 = vxpose.xlu1.b32.cont [8/16] (narrow) %v2236_v27, 8 }
  0xb8   : > { %2202 = vxpose.xlu0.b32.cont [9/16] (narrow) %v2611_v2, 8  ;;  %v2106_v2 = vpop.trf.xlu1 }
  0xb9   : > { %v2110_v8 = vunpack.i.h.bf16 %v2106_v2 }
  0xba   : > { %2239 = vxpose.xlu1.b32.cont [9/16] (narrow) %v2238_v29, 8 }
  0xbc   : > { %2204 = vxpose.xlu0.b32.cont [10/16] (narrow) %v2633_v11, 8  ;;  %v3332_v11 = vpack.i.bf16 %v2466_v26, %v2730_v49  ;;  %v3334_v26 = vpack.i.bf16 %v2488_v32, %v2743_v60  ;;  %v3337_v60 = vld [vmem:[#allocation37_spill] sm:$0xff] }
  0xbe   : > { %2241 = vxpose.xlu1.b32.cont [10/16] (narrow) %v2240_v33, 8 }
  0xc0   : > { %2206 = vxpose.xlu0.b32.cont [11/16] (narrow) %v2655_v21, 8  ;;  %v1940_v21 = vld [vmem:[%s2407_s22 + $0x199] sm:$0xff] }
  0xc1   : > { %v2250_v57 = vpack.i.bf16 %v1940_v21, %v2921_v53 }
  0xc2   : > { %2243 = vxpose.xlu1.b32.cont [11/16] (narrow) %v2242_v35, 8 }
  0xc4   : > { %2208 = vxpose.xlu0.b32.cont [12/16] (narrow) %v2677_v14, 8  ;;  %v1149_v14 = vrot.slane %v2110_v8, 4  ;;  %v3346_v8 = vld [vmem:[#allocation16_spill] sm:$0xff] }
  0xc6   : > { %2245 = vxpose.xlu1.b32.cont [12/16] (narrow) %v2244_v39, 8  ;;  %v1172_v35 = vsel %vm1170_vm0, %v2073_v10, %v1149_v14  ;;  %v2300_v39 = vpack.i.bf16 %v3336_v38, %v2507_v37  ;;  %v2267_v37 = vpack.i.bf16 %v3342_v31, %v3341_v30  ;;  %v3348_v14 = vld [vmem:[#allocation14_spill] sm:$0xff]  ;;  %v3349_v10 = vld [vmem:[#allocation40_spill] sm:$0xff]  ;;  %v3360_v38 = vld [vmem:[#allocation23_spill] sm:$0xff] }
  0xc7   : > { %v3367_v31 = vld [vmem:[#allocation30_spill] sm:$0xff] }
  0xc8   : > { %2210 = vxpose.xlu0.b32.cont [13/16] (narrow) %v2699_v15, 8  ;;  %v2252_v15 = vpack.i.bf16 %v1941_v61, %v2928_v59 }
  0xca   : > { %2247 = vxpose.xlu1.b32.cont [13/16] (narrow) %v2246_v45, 8 }
  0xcc   : > { %2212 = vxpose.xlu0.b32.cont [14/16] (narrow) %v2721_v7, 8  ;;  %v2107_v7 = vunpack.i.l.bf16 %v2106_v2 }
  0xce   : > { %2249 = vxpose.xlu1.b32.cont [14/16] (narrow) %v2248_v51, 8  ;;  %v1148_v20 = vrot.slane %v2107_v7, 4  ;;  %v3338_v51 = vld [vmem:[#allocation10_spill] sm:$0xff]  ;;  %v2269_v7 = vpack.i.bf16 %v3346_v8, %v3345_v5 }
  0xcf   : > { %v2265_v21 = vpack.i.bf16 %v3338_v51, %v3337_v60  ;;  %v3364_v51 = vld [vmem:[#allocation26_spill] sm:$0xff] }
  0xd0   : > { %2214 = vxpose.xlu0.b32.cont [15/16] (narrow) %v2213_v55, 8  ;;  %v1171_v24 = vsel %vm1170_vm0, %v2070_v19, %v1148_v20  ;;  %v3339_v55 = vld [vmem:[#allocation9_spill] sm:$0xff]  ;;  %v3350_v19 = vld [vmem:[#allocation19_spill] sm:$0xff] }
  0xd2   : > { %2251 = vxpose.xlu1.b32.cont [15/16] (narrow) %v2250_v57, 8  ;;  %v3340_v57 = vld [vmem:[#allocation8_spill] sm:$0xff] }
  0xd3   : > { %v2302_v61 = vpack.i.bf16 %v3340_v57, %v3339_v55  ;;  %v3365_v55 = vld [vmem:[#allocation44_spill] sm:$0xff]  ;;  %v3366_v57 = vld [vmem:[#allocation31_spill] sm:$0xff] }
  0xd4   : > { %2216 = vxpose.xlu0.b32.end [16/16] (narrow) %v2215_v63, 8  ;;  %v3343_v63 = vld [vmem:[#allocation12_spill] sm:$0xff] }
  0xd6   : > { %2253 = vxpose.xlu1.b32.end [16/16] (narrow) %v2252_v15, 8  ;;  %v3344_v15 = vld [vmem:[#allocation11_spill] sm:$0xff] }
  0xd7   : > { %v2304_v2 = vpack.i.bf16 %v3344_v15, %v3343_v63  ;;  %v3369_v15 = vld [vmem:[#allocation45_spill] sm:$0xff] }
  0xd8   : > { %2260 = vxpose.xlu0.b32.start [1/16] (narrow) %v3332_v11, 8  ;;  %v2143_v17 = vpop.trf.xlu0  ;;  %v3347_v11 = vld [vmem:[#allocation15_spill] sm:$0xff] }
  0xd9   : > { %v2147_v27 = vunpack.i.h.bf16 %v2143_v17  ;;  %v2144_v29 = vunpack.i.l.bf16 %v2143_v17  ;;  %v2306_v20 = vpack.i.bf16 %v3348_v14, %v3347_v11  ;;  %v3372_v11 = vld [vmem:[#allocation32_spill] sm:$0xff] }
  0xda   : > { %2297 = vxpose.xlu1.b32.start [1/16] (narrow) %v3333_v18, 8  ;;  %v2180_v36 = vpop.trf.xlu1  ;;  %v2271_v18 = vpack.i.bf16 %v3350_v19, %v3349_v10  ;;  %v3373_v19 = vld [vmem:[#allocation2_spill] sm:$0xff] }
  0xdb   : > { %v2184_v1 = vunpack.i.h.bf16 %v2180_v36  ;;  %v2181_v23 = vunpack.i.l.bf16 %v2180_v36  ;;  %v3352_v36 = vld [vmem:[#allocation17_spill] sm:$0xff] }
  0xdc   : > { %2262 = vxpose.xlu0.b32.cont [2/16] (narrow) %v3334_v26, 8  ;;  %v3356_v26 = vld [vmem:[#allocation20_spill] sm:$0xff] }
  0xdd   : > { %v1155_v49 = vrot.slane %v2184_v1, 4  ;;  %v1154_v33 = vrot.slane %v2181_v23, 4  ;;  %v3353_v1 = vld [vmem:[#allocation41_spill] sm:$0xff]  ;;  %v3354_v23 = vld [vmem:[#allocation22_spill] sm:$0xff] }
  0xde   : > { %2299 = vxpose.xlu1.b32.cont [2/16] (narrow) %v3335_v25, 8  ;;  %v3359_v25 = vld [vmem:[#allocation24_spill] sm:$0xff] }
  0xdf   : > { %v1174_v41 = vsel %vm1170_vm0, %v2147_v27, %v1155_v49  ;;  %v1173_v45 = vsel %vm1170_vm0, %v2144_v29, %v1154_v33  ;;  %v2273_v27 = vpack.i.bf16 %v3354_v23, %v3353_v1  ;;  %v3355_v29 = vld [vmem:[#allocation21_spill] sm:$0xff]  ;;  %v3357_v33 = vld [vmem:[#allocation42_spill] sm:$0xff]  ;;  %v3374_v23 = vld [vmem:[#allocation35_spill] sm:$0xff] }
  0xe0   : > { %v1997_v47 = vpack.c.bf16 %v1174_v41, %v1172_v35  ;;  %v1999_v32 = vpack.c.bf16 %v1173_v45, %v1171_v24  ;;  %2264 = vxpose.xlu0.b32.cont [3/16] (narrow) %v2263_v12, 8  ;;  %v3351_v12 = vld [vmem:[#allocation18_spill] sm:$0xff]  ;;  %v2310_v49 = vpack.i.bf16 %v3356_v26, %v3355_v29  ;;  %v3358_v35 = vld [vmem:[#allocation25_spill] sm:$0xff]  ;;  %v3361_v41 = vld [vmem:[#allocation43_spill] sm:$0xff] }
  0xe1   : > { %v2308_v17 = vpack.i.bf16 %v3352_v36, %v3351_v12  ;;  %v2275_v24 = vpack.i.bf16 %v3358_v35, %v3357_v33  ;;  %v3362_v45 = vld [vmem:[#allocation28_spill] sm:$0xff]  ;;  %v2285_v12 = vpack.i.bf16 %v2425_v9, %v2867_v54  ;;  %v2322_v36 = vpack.i.bf16 %v2420_v6, %v2873_v13  ;;  %v3376_v26 = vld [vmem:[#allocation3_spill] sm:$0xff] }
  0xe2   : > { %2301 = vxpose.xlu1.b32.cont [3/16] (narrow) %v2300_v39, 8  ;;  %1998 = vmatprep.subr.bf16.mxu0 %v1997_v47  ;;  %v2312_v39 = vpack.i.bf16 %v3360_v38, %v3359_v25  ;;  %v3377_v35 = vld [vmem:[#allocation36_spill] sm:$0xff]  ;;  %v3379_v25 = vld [vmem:[#allocation5_spill] sm:$0xff]  ;;  %v2357_v38 = vmov 0.0  }
  0xe3   : > { %2005 = vmatprep.subr.bf16.mxu1 %v1997_v47  ;;  %2000 = vmatpush1.bf16.msra.mxu0 %v1999_v32  ;;  %v2277_v47 = vpack.i.bf16 %v3362_v45, %v3361_v41  ;;  %v1188_v45 = vld [vmem:[%s3229_s1 + $0x48] sm:$0xff] }
  0xe4   : > { %2008 = vmatpush1.bf16.msra.mxu1 %v1999_v32  ;;  %2266 = vxpose.xlu0.b32.cont [4/16] (narrow) %v2265_v21, 8  ;;  %v3363_v32 = vld [vmem:[#allocation27_spill] sm:$0xff] }
  0xe5   : > { %v2314_v21 = vpack.i.bf16 %v3364_v51, %v3363_v32  ;;  %1314 = vmatprep.mubr.f32.mxu0 %v2357_v38  ;;  %1362 = vmatprep.mubr.f32.mxu1 %v2357_v38  ;;  %v1189_v32 = vld [vmem:[%s3229_s1 + $0x50] sm:$0xff]  ;;  %v1182_v51 = vld [vmem:[%s3229_s1 + $0x18] sm:$0xff] }
  0xe6   : > { %2303 = vxpose.xlu1.b32.cont [4/16] (narrow) %v2302_v61, 8  ;;  %v2279_v61 = vpack.i.bf16 %v3366_v57, %v3365_v55  ;;  %v1191_v57 = vld [vmem:[%s3229_s1 + $0x60] sm:$0xff] }
  0xe8   : > { %2268 = vxpose.xlu0.b32.cont [5/16] (narrow) %v2267_v37, 8  ;;  %v3368_v37 = vld [vmem:[#allocation29_spill] sm:$0xff] }
  0xe9   : > { %v2316_v63 = vpack.i.bf16 %v3368_v37, %v3367_v31  ;;  %v1192_v31 = vld [vmem:[%s3229_s1 + $0x68] sm:$0xff]  ;;  %v1185_v37 = vld [vmem:[%s3229_s1 + $0x30] sm:$0xff] }
  0xea   : > { %2305 = vxpose.xlu1.b32.cont [5/16] (narrow) %v2304_v2, 8  ;;  %v3370_v2 = vld [vmem:[#allocation34_spill] sm:$0xff] }
  0xeb   : > { %v2281_v8 = vpack.i.bf16 %v3370_v2, %v3369_v15  ;;  %v1194_v2 = vld [vmem:[%s3229_s1 + $0x78] sm:$0xff] }
  0xec   : > { %2270 = vxpose.xlu0.b32.cont [6/16] (narrow) %v2269_v7, 8  ;;  %v3371_v7 = vld [vmem:[#allocation33_spill] sm:$0xff] }
  0xed   : > { %v2318_v14 = vpack.i.bf16 %v3372_v11, %v3371_v7 }
  0xee   : > { %2307 = vxpose.xlu1.b32.cont [6/16] (narrow) %v2306_v20, 8  ;;  %v2283_v20 = vpack.i.bf16 %v2416_v4, %v2853_v44 }
  0xf0   : > { %2272 = vxpose.xlu0.b32.cont [7/16] (narrow) %v2271_v18, 8  ;;  %v2320_v18 = vpack.i.bf16 %v3373_v19, %v2859_v22  ;;  %v3378_v22 = vld [vmem:[#allocation6_spill] sm:$0xff] }
  0xf2   : > { %2309 = vxpose.xlu1.b32.cont [7/16] (narrow) %v2308_v17, 8  ;;  %v1908_v17 = vld [vmem:[%s2407_s22 + $0x198] sm:$0xff] }
  0xf3   : > { %v2324_v4 = vpack.i.bf16 %v3376_v26, %v1908_v17 }
  0xf4   : > { %2274 = vxpose.xlu0.b32.cont [8/16] (narrow) %v2273_v27, 8  ;;  %v3375_v27 = vld [vmem:[#allocation4_spill] sm:$0xff] }
  0xf5   : > { %v2287_v29 = vpack.i.bf16 %v3375_v27, %v3374_v23 }
  0xf6   : > { %2311 = vxpose.xlu1.b32.cont [8/16] (narrow) %v2310_v49, 8  ;;  %v1909_v49 = vld [vmem:[%s2407_s22 + $0x1a0] sm:$0xff] }
  0xf7   : > { %v2326_v9 = vpack.i.bf16 %v3379_v25, %v1909_v49 }
  0xf8   : > { %2276 = vxpose.xlu0.b32.cont [9/16] (narrow) %v2275_v24, 8  ;;  %v2289_v24 = vpack.i.bf16 %v3378_v22, %v3377_v35 }
  0xfa   : > { %2313 = vxpose.xlu1.b32.cont [9/16] (narrow) %v2312_v39, 8 }
  0xfc   : > { %2278 = vxpose.xlu0.b32.cont [10/16] (narrow) %v2277_v47, 8  ;;  %v1181_v47 = vld [vmem:[%s3229_s1 + $0x10] sm:$0xff] }
  0xfe   : > { %2315 = vxpose.xlu1.b32.cont [10/16] (narrow) %v2314_v21, 8  ;;  %v1190_v21 = vld [vmem:[%s3229_s1 + $0x58] sm:$0xff] }
 0x100   : > { %2280 = vxpose.xlu0.b32.cont [11/16] (narrow) %v2279_v61, 8  ;;  %v1184_v61 = vld [vmem:[%s3229_s1 + $0x28] sm:$0xff] }
 0x102   : > { %2317 = vxpose.xlu1.b32.cont [11/16] (narrow) %v2316_v63, 8  ;;  %v1193_v63 = vld [vmem:[%s3229_s1 + $0x70] sm:$0xff] }
 0x104   : > { %2282 = vxpose.xlu0.b32.cont [12/16] (narrow) %v2281_v8, 8 }
 0x106   : > { %2319 = vxpose.xlu1.b32.cont [12/16] (narrow) %v2318_v14, 8 }
 0x108   : > { %2284 = vxpose.xlu0.b32.cont [13/16] (narrow) %v2283_v20, 8 }
 0x10a   : > { %2321 = vxpose.xlu1.b32.cont [13/16] (narrow) %v2320_v18, 8 }
 0x10c   : > { %2286 = vxpose.xlu0.b32.cont [14/16] (narrow) %v2285_v12, 8 }
 0x10e   : > { %2323 = vxpose.xlu1.b32.cont [14/16] (narrow) %v2322_v36, 8 }
 0x110   : > { %2288 = vxpose.xlu0.b32.cont [15/16] (narrow) %v2287_v29, 8 }
 0x112   : > { %2325 = vxpose.xlu1.b32.cont [15/16] (narrow) %v2324_v4, 8 }
 0x114   : > { %2290 = vxpose.xlu0.b32.end [16/16] (narrow) %v2289_v24, 8 }
 0x116   : > { %2327 = vxpose.xlu1.b32.end [16/16] (narrow) %v2326_v9, 8 }
 0x118   : > { %1114 = vxpose.xlu0.b32.start [1/16] (narrow) %v2766_v42, 8  ;;  %v2217_v6 = vpop.trf.xlu0 }
 0x11a   : > { %1082 = vxpose.xlu1.b32.start [1/16] (narrow) %v2763_v43, 8  ;;  %v2254_v13 = vpop.trf.xlu1  ;;  %v1972_v43 = vld [vmem:[%s2407_s22 + $0x19a] sm:$0xff] }
 0x11b   : > { %v2255_v42 = vunpack.i.l.bf16 %v2254_v13 }
 0x11c   : > { %1115 = vxpose.xlu0.b32.cont [2/16] (narrow) %v2775_v48, 8  ;;  %v1973_v48 = vld [vmem:[%s2407_s22 + $0x1a2] sm:$0xff] }
 0x11e   : > { %1083 = vxpose.xlu1.b32.cont [2/16] (narrow) %v3337_v60, 8 }
 0x120   : > { %1116 = vxpose.xlu0.b32.cont [3/16] (narrow) %v2784_v16, 8  ;;  %v2258_v16 = vunpack.i.h.bf16 %v2254_v13 }
 0x122   : > { %1084 = vxpose.xlu1.b32.cont [3/16] (narrow) %v3341_v30, 8 }
 0x124   : > { %1117 = vxpose.xlu0.b32.cont [4/16] (narrow) %v2793_v50, 8  ;;  %v1167_v50 = vrot.slane %v2258_v16, 4 }
 0x126   : > { %1085 = vxpose.xlu1.b32.cont [4/16] (narrow) %v3345_v5, 8 }
 0x128   : > { %1118 = vxpose.xlu0.b32.cont [5/16] (narrow) %v2802_v28, 8 }
 0x12a   : > { %1086 = vxpose.xlu1.b32.cont [5/16] (narrow) %v3349_v10, 8 }
 0x12c   : > { %1119 = vxpose.xlu0.b32.cont [6/16] (narrow) %v2811_v34, 8 }
 0x12e   : > { %1087 = vxpose.xlu1.b32.cont [6/16] (narrow) %v3353_v1, 8  ;;  %v1179_v1 = vld [vmem:[%s3229_s1] sm:$0xff] }
 0x130   : > { %1120 = vxpose.xlu0.b32.cont [7/16] (narrow) %v2820_v40, 8 }
 0x132   : > { %1088 = vxpose.xlu1.b32.cont [7/16] (narrow) %v3357_v33, 8  ;;  %v1187_v33 = vld [vmem:[%s3229_s1 + $0x40] sm:$0xff] }
 0x134   : > { %1121 = vxpose.xlu0.b32.cont [8/16] (narrow) %v2829_v46, 8 }
 0x136   : > { %1089 = vxpose.xlu1.b32.cont [8/16] (narrow) %v3361_v41, 8  ;;  %v1180_v41 = vld [vmem:[%s3229_s1 + $0x8] sm:$0xff] }
 0x138   : > { %1122 = vxpose.xlu0.b32.cont [9/16] (narrow) %v2838_v52, 8 }
 0x13a   : > { %1090 = vxpose.xlu1.b32.cont [9/16] (narrow) %v3365_v55, 8  ;;  %v1183_v55 = vld [vmem:[%s3229_s1 + $0x20] sm:$0xff] }
 0x13c   : > { %1123 = vxpose.xlu0.b32.cont [10/16] (narrow) %v2847_v58, 8 }
 0x13e   : > { %1091 = vxpose.xlu1.b32.cont [10/16] (narrow) %v3369_v15, 8  ;;  %v1186_v15 = vld [vmem:[%s3229_s1 + $0x38] sm:$0xff] }
 0x140   : > { %1124 = vxpose.xlu0.b32.cont [11/16] (narrow) %v2856_v0, 8 }
 0x142   : > { %1092 = vxpose.xlu1.b32.cont [11/16] (narrow) %v2853_v44, 8  ;;  %v2221_v44 = vunpack.i.h.bf16 %v2217_v6 }
 0x144   : > { %1125 = vxpose.xlu0.b32.cont [12/16] (narrow) %v2870_v62, 8  ;;  %v1161_v62 = vrot.slane %v2255_v42, 4 }
 0x146   : > { %1093 = vxpose.xlu1.b32.cont [12/16] (narrow) %v2867_v54, 8  ;;  %v2218_v54 = vunpack.i.l.bf16 %v2217_v6  ;;  %v1176_v34 = vsel %vm1170_vm0, %v2221_v44, %v1161_v62 }
 0x148   : > { %1126 = vxpose.xlu0.b32.cont [13/16] (narrow) %v2921_v53, 8 }
 0x14a   : > { %1094 = vxpose.xlu1.b32.cont [13/16] (narrow) %v3374_v23, 8 }
 0x14c   : > { %1127 = vxpose.xlu0.b32.cont [14/16] (narrow) %v2928_v59, 8 }
 0x14e   : > { %1095 = vxpose.xlu1.b32.cont [14/16] (narrow) %v3377_v35, 8 }
 0x150   : > { %1128 = vxpose.xlu0.b32.cont [15/16] (narrow) %v1972_v43, 8 }
 0x152   : > { %1096 = vxpose.xlu1.b32.cont [15/16] (narrow) %v2747_v56, 8 }
 0x154   : > { %1129 = vxpose.xlu0.b32.end [16/16] (narrow) %v1973_v48, 8 }
 0x156   : > { %1097 = vxpose.xlu1.b32.end [16/16] (narrow) %v2757_v3, 8 }
 0x158   : > { %v2291_v28 = vpop.trf.xlu0 }
 0x159   : > { %v2295_v40 = vunpack.i.h.bf16 %v2291_v28  ;;  %v2292_v46 = vunpack.i.l.bf16 %v2291_v28 }
 0x15a   : > { %v2328_v52 = vpop.trf.xlu1 }
 0x15b   : > { %v2332_v58 = vunpack.i.h.bf16 %v2328_v52  ;;  %v2329_v0 = vunpack.i.l.bf16 %v2328_v52  ;;  %v1166_v53 = vrot.slane %v2295_v40, 4  ;;  %v1160_v59 = vrot.slane %v2292_v46, 4 }
 0x15d   : > { %v1178_v56 = vsel %vm1170_vm0, %v2329_v0, %v1167_v50  ;;  %v1175_v30 = vsel %vm1170_vm0, %v2218_v54, %v1160_v59  ;;  %v1177_v5 = vsel %vm1170_vm0, %v2332_v58, %v1166_v53 }
 0x15e   : > { %v2001_v60 = vpack.c.bf16 %v1178_v56, %v1176_v34  ;;  %v2003_v3 = vpack.c.bf16 %v1177_v5, %v1175_v30 }
 0x160   : > { %2002 = vmatprep.subr.bf16.mxu0 %v2001_v60  ;;  %2006 = vmatprep.subr.bf16.mxu1 %v2001_v60 }
 0x161   : > { %2004 = vmatpush1.bf16.msra.mxu0 %v2003_v3  ;;  %2009 = vmatpush1.bf16.msra.mxu1 %v2003_v3 }
 0x198   : > { %v1130_v10 = vpop.trf.xlu0 }
 0x199   : > { %1974 = vmatprep.subr.msk.mxu0 %vm1170_vm0, %v1130_v10  ;;  %2007 = vmatprep.subr.msk.mxu1 %vm1170_vm0, %v1130_v10 }
 0x19a   : > { %v1098_v39 = vpop.trf.xlu1 }
 0x19b   : > { %1975 = vmatpush1.msk.msra.mxu0 %vm1170_vm0, %v1098_v39  ;;  %2010 = vmatpush1.msk.msra.mxu1 %vm1170_vm0, %v1098_v39 }
 0x19c   : > { %1976 = vmatmul.mubr.msk.f32.vlgmr.msra.gmra.mrb[0].mxu0 %vm1195_vm1, %v1179_v1  ;;  %1984 = vmatmul.mubr.msk.f32.vlgmr.msra.gmra.mrb[0].mxu1 %vm1195_vm1, %v1187_v33 }
 0x19d   : > { %1320 = vmatprep.mubr.f32.mxu0 %v2357_v38  ;;  %1368 = vmatprep.mubr.f32.mxu1 %v2357_v38 }
 0x1a0   : > { %1977 = vmatmul.mubr.msk.f32.gmra.mrb[2].mxu0 %vm1195_vm1, %v1180_v41  ;;  %1985 = vmatmul.mubr.msk.f32.gmra.mrb[2].mxu1 %vm1195_vm1, %v1188_v45 }
 0x1a1   : > { %1326 = vmatprep.mubr.f32.mxu0 %v2357_v38  ;;  %1374 = vmatprep.mubr.f32.mxu1 %v2357_v38 }
 0x1a4   : > { %1978 = vmatmul.mubr.msk.f32.gmra.mrb[4].mxu0 %vm1195_vm1, %v1181_v47  ;;  %1986 = vmatmul.mubr.msk.f32.gmra.mrb[4].mxu1 %vm1195_vm1, %v1189_v32 }
 0x1a5   : > { %1332 = vmatprep.mubr.f32.mxu0 %v2357_v38  ;;  %1380 = vmatprep.mubr.f32.mxu1 %v2357_v38 }
 0x1a8   : > { %1979 = vmatmul.mubr.msk.f32.gmra.mrb[6].mxu0 %vm1195_vm1, %v1182_v51  ;;  %1987 = vmatmul.mubr.msk.f32.gmra.mrb[6].mxu1 %vm1195_vm1, %v1190_v21 }
 0x1a9   : > { %1338 = vmatprep.mubr.f32.mxu0 %v2357_v38  ;;  %1386 = vmatprep.mubr.f32.mxu1 %v2357_v38 }
 0x1ac   : > { %1980 = vmatmul.mubr.msk.f32.gmra.mrb[8].mxu0 %vm1195_vm1, %v1183_v55  ;;  %1988 = vmatmul.mubr.msk.f32.gmra.mrb[8].mxu1 %vm1195_vm1, %v1191_v57 }
 0x1ad   : > { %1344 = vmatprep.mubr.f32.mxu0 %v2357_v38  ;;  %1392 = vmatprep.mubr.f32.mxu1 %v2357_v38 }
 0x1b0   : > { %1981 = vmatmul.mubr.msk.f32.gmra.mrb[10].mxu0 %vm1195_vm1, %v1184_v61  ;;  %1989 = vmatmul.mubr.msk.f32.gmra.mrb[10].mxu1 %vm1195_vm1, %v1192_v31 }
 0x1b1   : > { %1350 = vmatprep.mubr.f32.mxu0 %v2357_v38  ;;  %1398 = vmatprep.mubr.f32.mxu1 %v2357_v38 }
 0x1b4   : > { %1982 = vmatmul.mubr.msk.f32.gmra.mrb[12].mxu0 %vm1195_vm1, %v1185_v37  ;;  %1990 = vmatmul.mubr.msk.f32.gmra.mrb[12].mxu1 %vm1195_vm1, %v1193_v63 }
 0x1b5   : > { %1356 = vmatprep.mubr.f32.mxu0 %v2357_v38  ;;  %1404 = vmatprep.mubr.f32.mxu1 %v2357_v38 }
 0x1b8   : > { %1983 = vmatmul.mubr.msk.f32.gmra.mrb[14].mxu0 %vm1195_vm1, %v1186_v15  ;;  %1991 = vmatmul.mubr.msk.f32.gmra.mrb[14].mxu1 %vm1195_vm1, %v1194_v2 }
 0x26f   : > { %v1316_v8 = vpop.f32.mrb[0].mxu0  ;;  %v1364_v7 = vpop.f32.mrb[0].mxu1 }
 0x270   : > { %1411 = vst [vmem:[%s260_s10] sm:$0xff] %v1316_v8  ;;  %v1318_v11 = vpop.f32.mrb[1].mxu0  ;;  %v1494_v14 = vmul.f32 %v1364_v7, %v1364_v7  ;;  %v1366_v20 = vpop.f32.mrb[1].mxu1  ;;  %v1478_v19 = vmul.f32 %v1316_v8, %v1316_v8 }
 0x271   : > { %1412 = vst [vmem:[%s260_s10 + $0x8] sm:$0xff] %v1318_v11  ;;  %v1495_v18 = vmul.f32 %v1366_v20, %v1366_v20  ;;  %v1413_v12 = vadd.f32 %v1318_v11, %v1316_v8  ;;  %v1437_v36 = vadd.f32 %v1366_v20, %v1364_v7  ;;  %v1479_v17 = vmul.f32 %v1318_v11, %v1318_v11 }
 0x273   : > { %1414 = vadd.xlane.f32.xlu0 %v1413_v12  ;;  %v1322_v23 = vpop.f32.mrb[2].mxu0  ;;  %v1370_v27 = vpop.f32.mrb[2].mxu1  ;;  %v1510_v29 = vadd.f32 %v1479_v17, %v1478_v19  ;;  %v3129_v26 = vadd.f32 %v1495_v18, %v1494_v14 }
 0x274   : > { %v1480_v4 = vmul.f32 %v1322_v23, %v1322_v23  ;;  %v1324_v49 = vpop.f32.mrb[3].mxu0  ;;  %v1496_v35 = vmul.f32 %v1370_v27, %v1370_v27  ;;  %v1372_v22 = vpop.f32.mrb[3].mxu1 }
 0x275   : > { %v1481_v24 = vmul.f32 %v1324_v49, %v1324_v49  ;;  %v1497_v25 = vmul.f32 %v1372_v22, %v1372_v22  ;;  %v1416_v9 = vadd.f32 %v1324_v49, %v1322_v23  ;;  %v1440_v6 = vadd.f32 %v1372_v22, %v1370_v27 }
 0x277   : > { %1438 = vadd.xlane.f32.xlu0 %v1437_v36  ;;  %1417 = vadd.xlane.f32.xlu1 %v1416_v9  ;;  %v1376_v13 = vpop.f32.mrb[4].mxu1  ;;  %v1328_v38 = vpop.f32.mrb[4].mxu0  ;;  %v1513_v43 = vadd.f32 %v1481_v24, %v1480_v4  ;;  %v3131_v42 = vadd.f32 %v1497_v25, %v1496_v35 }
 0x278   : > { %v1498_v48 = vmul.f32 %v1376_v13, %v1376_v13  ;;  %v1482_v44 = vmul.f32 %v1328_v38, %v1328_v38  ;;  %v1330_v16 = vpop.f32.mrb[5].mxu0  ;;  %v1378_v62 = vpop.f32.mrb[5].mxu1 }
 0x279   : > { %v1483_v54 = vmul.f32 %v1330_v16, %v1330_v16  ;;  %v1499_v50 = vmul.f32 %v1378_v62, %v1378_v62  ;;  %v1443_v28 = vadd.f32 %v1378_v62, %v1376_v13  ;;  %v1419_v34 = vadd.f32 %v1330_v16, %v1328_v38 }
 0x27b   : > { %1511 = vadd.xlane.f32.xlu0 %v1510_v29  ;;  %1441 = vadd.xlane.f32.xlu1 %v1440_v6  ;;  %v1334_v40 = vpop.f32.mrb[6].mxu0  ;;  %v1382_v46 = vpop.f32.mrb[6].mxu1  ;;  %v3133_v52 = vadd.f32 %v1483_v54, %v1482_v44  ;;  %v3135_v58 = vadd.f32 %v1499_v50, %v1498_v48 }
 0x27c   : > { %v1484_v0 = vmul.f32 %v1334_v40, %v1334_v40  ;;  %v1336_v53 = vpop.f32.mrb[7].mxu0  ;;  %v1500_v59 = vmul.f32 %v1382_v46, %v1382_v46  ;;  %v1384_v56 = vpop.f32.mrb[7].mxu1 }
 0x27d   : > { %v1485_v60 = vmul.f32 %v1336_v53, %v1336_v53  ;;  %v1501_v30 = vmul.f32 %v1384_v56, %v1384_v56  ;;  %v1422_v5 = vadd.f32 %v1336_v53, %v1334_v40  ;;  %v1446_v3 = vadd.f32 %v1384_v56, %v1382_v46 }
 0x27f   : > { %1444 = vadd.xlane.f32.xlu0 %v1443_v28  ;;  %1514 = vadd.xlane.f32.xlu1 %v1513_v43  ;;  %v1340_v10 = vpop.f32.mrb[8].mxu0  ;;  %v1388_v1 = vpop.f32.mrb[8].mxu1  ;;  %v1519_v33 = vadd.f32 %v1485_v60, %v1484_v0  ;;  %v3137_v39 = vadd.f32 %v1501_v30, %v1500_v59 }
 0x280   : > { %v1486_v41 = vmul.f32 %v1340_v10, %v1340_v10  ;;  %v1342_v45 = vpop.f32.mrb[9].mxu0  ;;  %v1502_v47 = vmul.f32 %v1388_v1, %v1388_v1  ;;  %v1390_v32 = vpop.f32.mrb[9].mxu1 }
 0x281   : > { %v1487_v51 = vmul.f32 %v1342_v45, %v1342_v45  ;;  %v1425_v21 = vadd.f32 %v1342_v45, %v1340_v10  ;;  %v1503_v55 = vmul.f32 %v1390_v32, %v1390_v32  ;;  %v1449_v57 = vadd.f32 %v1390_v32, %v1388_v1 }
 0x283   : > { %1420 = vadd.xlane.f32.xlu1 %v1419_v34  ;;  %1426 = vadd.xlane.f32.xlu0 %v1425_v21  ;;  %v1346_v61 = vpop.f32.mrb[10].mxu0  ;;  %v1394_v31 = vpop.f32.mrb[10].mxu1  ;;  %v1522_v37 = vadd.f32 %v1487_v51, %v1486_v41  ;;  %v1546_v63 = vadd.f32 %v1503_v55, %v1502_v47 }
 0x284   : > { %v1488_v15 = vmul.f32 %v1346_v61, %v1346_v61  ;;  %v1348_v2 = vpop.f32.mrb[11].mxu0  ;;  %v1504_v8 = vmul.f32 %v1394_v31, %v1394_v31  ;;  %v1396_v7 = vpop.f32.mrb[11].mxu1 }
 0x285   : > { %v1489_v11 = vmul.f32 %v1348_v2, %v1348_v2  ;;  %v1505_v14 = vmul.f32 %v1396_v7, %v1396_v7  ;;  %v1428_v20 = vadd.f32 %v1348_v2, %v1346_v61  ;;  %v1452_v19 = vadd.f32 %v1396_v7, %v1394_v31 }
 0x287   : > { %1423 = vadd.xlane.f32.xlu1 %v1422_v5  ;;  %1450 = vadd.xlane.f32.xlu0 %v1449_v57  ;;  %v1352_v18 = vpop.f32.mrb[12].mxu0  ;;  %v1400_v12 = vpop.f32.mrb[12].mxu1  ;;  %v1525_v36 = vadd.f32 %v1489_v11, %v1488_v15  ;;  %v1549_v17 = vadd.f32 %v1505_v14, %v1504_v8 }
 0x288   : > { %v1490_v23 = vmul.f32 %v1352_v18, %v1352_v18  ;;  %v1354_v27 = vpop.f32.mrb[13].mxu0  ;;  %v1506_v29 = vmul.f32 %v1400_v12, %v1400_v12  ;;  %v1402_v4 = vpop.f32.mrb[13].mxu1 }
 0x289   : > { %v1491_v49 = vmul.f32 %v1354_v27, %v1354_v27  ;;  %v1431_v35 = vadd.f32 %v1354_v27, %v1352_v18  ;;  %v1507_v22 = vmul.f32 %v1402_v4, %v1402_v4  ;;  %v1455_v24 = vadd.f32 %v1402_v4, %v1400_v12 }
 0x28b   : > { %1447 = vadd.xlane.f32.xlu1 %v1446_v3  ;;  %1432 = vadd.xlane.f32.xlu0 %v1431_v35  ;;  %v1358_v25 = vpop.f32.mrb[14].mxu0  ;;  %v1406_v9 = vpop.f32.mrb[14].mxu1  ;;  %v1528_v6 = vadd.f32 %v1491_v49, %v1490_v23  ;;  %v1552_v13 = vadd.f32 %v1507_v22, %v1506_v29 }
 0x28c   : > { %v1492_v38 = vmul.f32 %v1358_v25, %v1358_v25  ;;  %v1360_v43 = vpop.f32.mrb[15].mxu0  ;;  %v1508_v48 = vmul.f32 %v1406_v9, %v1406_v9  ;;  %v1408_v44 = vpop.f32.mrb[15].mxu1 }
 0x28d   : > { %v1434_v16 = vadd.f32 %v1360_v43, %v1358_v25  ;;  %v1493_v62 = vmul.f32 %v1360_v43, %v1360_v43  ;;  %v1458_v54 = vadd.f32 %v1408_v44, %v1406_v9  ;;  %v1509_v50 = vmul.f32 %v1408_v44, %v1408_v44 }
 0x28f   : > { %1429 = vadd.xlane.f32.xlu1 %v1428_v20  ;;  %1456 = vadd.xlane.f32.xlu0 %v1455_v24  ;;  %v1531_v28 = vadd.f32 %v1493_v62, %v1492_v38  ;;  %v1555_v34 = vadd.f32 %v1509_v50, %v1508_v48 }
 0x293   : > { %1453 = vadd.xlane.f32.xlu1 %v1452_v19  ;;  %1517 = vadd.xlane.f32.xlu0 %v3133_v52 }
 0x297   : > { %1520 = vadd.xlane.f32.xlu1 %v1519_v33  ;;  %1523 = vadd.xlane.f32.xlu0 %v1522_v37 }
 0x29b   : > { %1529 = vadd.xlane.f32.xlu0 %v1528_v6  ;;  %1435 = vadd.xlane.f32.xlu1 %v1434_v16 }
 0x29f   : > { %1535 = vadd.xlane.f32.xlu0 %v3129_v26  ;;  %1459 = vadd.xlane.f32.xlu1 %v1458_v54 }
 0x2a3   : > { %1541 = vadd.xlane.f32.xlu0 %v3135_v58  ;;  %1526 = vadd.xlane.f32.xlu1 %v1525_v36 }
 0x2a7   : > { %1547 = vadd.xlane.f32.xlu0 %v1546_v63  ;;  %1532 = vadd.xlane.f32.xlu1 %v1531_v28 }
 0x2ab   : > { %1553 = vadd.xlane.f32.xlu0 %v1552_v13  ;;  %1538 = vadd.xlane.f32.xlu1 %v3131_v42 }
 0x2af   : > { %1544 = vadd.xlane.f32.xlu1 %v3137_v39 }
 0x2b3   : > { %1550 = vadd.xlane.f32.xlu1 %v1549_v17 }
 0x2b7   : > { %1556 = vadd.xlane.f32.xlu1 %v1555_v34 }
 0x300   : > { %v1415_v26 = vpop.xlane.xlu0 %1414 }
 0x301   : > { %1462 = vst.msk [vmem:[%s3148_s14] sm:$0xff] %vm1461_vm2, %v1415_v26 }
 0x304   : > { %v1439_v42 = vpop.xlane.xlu0 %1438  ;;  %v1418_v40 = vpop.xlane.xlu1 %1417 }
 0x305   : > { %1470 = vst.msk [vmem:[%s3148_s14 + $0x40] sm:$0xff] %vm1461_vm2, %v1439_v42  ;;  %1463 = vst.msk [vmem:[%s3148_s14 + $0x8] sm:$0xff] %vm1461_vm2, %v1418_v40 }
 0x308   : > { %v1512_v46 = vpop.xlane.xlu0 %1511  ;;  %v1442_v52 = vpop.xlane.xlu1 %1441 }
 0x309   : > { %1558 = vst.msk [vmem:[%s3159_s20] sm:$0xff] %vm1461_vm2, %v1512_v46  ;;  %1471 = vst.msk [vmem:[%s3148_s14 + $0x48] sm:$0xff] %vm1461_vm2, %v1442_v52 }
 0x30c   : > { %v1445_v58 = vpop.xlane.xlu0 %1444  ;;  %v1515_v0 = vpop.xlane.xlu1 %1514 }
 0x30d   : > { %1472 = vst.msk [vmem:[%s3148_s14 + $0x50] sm:$0xff] %vm1461_vm2, %v1445_v58  ;;  %1559 = vst.msk [vmem:[%s3159_s20 + $0x8] sm:$0xff] %vm1461_vm2, %v1515_v0 }
 0x310   : > { %v1421_v53 = vpop.xlane.xlu1 %1420  ;;  %v1427_v59 = vpop.xlane.xlu0 %1426 }
 0x311   : > { %1464 = vst.msk [vmem:[%s3148_s14 + $0x10] sm:$0xff] %vm1461_vm2, %v1421_v53  ;;  %1466 = vst.msk [vmem:[%s3148_s14 + $0x20] sm:$0xff] %vm1461_vm2, %v1427_v59 }
 0x314   : > { %v1424_v56 = vpop.xlane.xlu1 %1423  ;;  %v1451_v60 = vpop.xlane.xlu0 %1450 }
 0x315   : > { %1465 = vst.msk [vmem:[%s3148_s14 + $0x18] sm:$0xff] %vm1461_vm2, %v1424_v56  ;;  %1474 = vst.msk [vmem:[%s3148_s14 + $0x60] sm:$0xff] %vm1461_vm2, %v1451_v60 }
 0x318   : > { %v1448_v30 = vpop.xlane.xlu1 %1447  ;;  %v1433_v5 = vpop.xlane.xlu0 %1432 }
 0x319   : > { %1473 = vst.msk [vmem:[%s3148_s14 + $0x58] sm:$0xff] %vm1461_vm2, %v1448_v30  ;;  %1468 = vst.msk [vmem:[%s3148_s14 + $0x30] sm:$0xff] %vm1461_vm2, %v1433_v5 }
 0x31c   : > { %v1430_v3 = vpop.xlane.xlu1 %1429  ;;  %v1457_v10 = vpop.xlane.xlu0 %1456 }
 0x31d   : > { %1467 = vst.msk [vmem:[%s3148_s14 + $0x28] sm:$0xff] %vm1461_vm2, %v1430_v3  ;;  %1476 = vst.msk [vmem:[%s3148_s14 + $0x70] sm:$0xff] %vm1461_vm2, %v1457_v10 }
 0x320   : > { %v1454_v1 = vpop.xlane.xlu1 %1453  ;;  %v1518_v33 = vpop.xlane.xlu0 %1517 }
 0x321   : > { %1475 = vst.msk [vmem:[%s3148_s14 + $0x68] sm:$0xff] %vm1461_vm2, %v1454_v1  ;;  %1560 = vst.msk [vmem:[%s3159_s20 + $0x10] sm:$0xff] %vm1461_vm2, %v1518_v33 }
 0x324   : > { %v1521_v39 = vpop.xlane.xlu1 %1520  ;;  %v1524_v41 = vpop.xlane.xlu0 %1523 }
 0x325   : > { %1561 = vst.msk [vmem:[%s3159_s20 + $0x18] sm:$0xff] %vm1461_vm2, %v1521_v39  ;;  %1562 = vst.msk [vmem:[%s3159_s20 + $0x20] sm:$0xff] %vm1461_vm2, %v1524_v41 }
 0x328   : > { %v1530_v45 = vpop.xlane.xlu0 %1529  ;;  %v1436_v47 = vpop.xlane.xlu1 %1435 }
 0x329   : > { %1564 = vst.msk [vmem:[%s3159_s20 + $0x30] sm:$0xff] %vm1461_vm2, %v1530_v45  ;;  %1469 = vst.msk [vmem:[%s3148_s14 + $0x38] sm:$0xff] %vm1461_vm2, %v1436_v47 }
 0x32c   : > { %v1536_v32 = vpop.xlane.xlu0 %1535  ;;  %v1460_v51 = vpop.xlane.xlu1 %1459 }
 0x32d   : > { %1566 = vst.msk [vmem:[%s3159_s20 + $0x40] sm:$0xff] %vm1461_vm2, %v1536_v32  ;;  %1477 = vst.msk [vmem:[%s3148_s14 + $0x78] sm:$0xff] %vm1461_vm2, %v1460_v51 }
 0x330   : > { %v1542_v21 = vpop.xlane.xlu0 %1541  ;;  %v1527_v55 = vpop.xlane.xlu1 %1526 }
 0x331   : > { %1568 = vst.msk [vmem:[%s3159_s20 + $0x50] sm:$0xff] %vm1461_vm2, %v1542_v21  ;;  %1563 = vst.msk [vmem:[%s3159_s20 + $0x28] sm:$0xff] %vm1461_vm2, %v1527_v55 }
 0x334   : > { %v1548_v57 = vpop.xlane.xlu0 %1547  ;;  %v1533_v61 = vpop.xlane.xlu1 %1532 }
 0x335   : > { %1570 = vst.msk [vmem:[%s3159_s20 + $0x60] sm:$0xff] %vm1461_vm2, %v1548_v57  ;;  %1565 = vst.msk [vmem:[%s3159_s20 + $0x38] sm:$0xff] %vm1461_vm2, %v1533_v61 }
 0x338   : > { %v1554_v31 = vpop.xlane.xlu0 %1553  ;;  %v1539_v37 = vpop.xlane.xlu1 %1538 }
 0x339   : > { %1572 = vst.msk [vmem:[%s3159_s20 + $0x70] sm:$0xff] %vm1461_vm2, %v1554_v31  ;;  %1567 = vst.msk [vmem:[%s3159_s20 + $0x48] sm:$0xff] %vm1461_vm2, %v1539_v37 }
 0x33c   : > { %v1545_v63 = vpop.xlane.xlu1 %1544 }
 0x33d   : > { %1569 = vst.msk [vmem:[%s3159_s20 + $0x58] sm:$0xff] %vm1461_vm2, %v1545_v63 }
 0x340   : > { %v1551_v15 = vpop.xlane.xlu1 %1550 }
 0x341   : > { %1571 = vst.msk [vmem:[%s3159_s20 + $0x68] sm:$0xff] %vm1461_vm2, %v1551_v15 }
 0x344   : > { %v1557_v2 = vpop.xlane.xlu1 %1556 }
 0x345   : > { %1573 = vst.msk [vmem:[%s3159_s20 + $0x78] sm:$0xff] %vm1461_vm2, %v1557_v2 }
 0x346 PF: > { %s15_s17 = sadd.s32 1, %s2355_s17   ;;  %s3380_s15 = smov %s2351_s16 }
 0x347   : > { %p12_p5 = scmp.ge.s32.totalorder %s15_s17, 4   ;;  %s3381_s16 = smov %s3383_s18 }
 0x349   :  { %14 = sbr.rel (!%p12_p5) target bundleno = 2 (0x2), region = 84 }

</bundles_post_ra>
